<compile_context>
chip_gen: v7x
topology: tpu7x:2x2x1
jax: 0.10.0
libtpu: 0.0.40
codegen_flags: <defaults>
</compile_context>

<pallas_src>
import functools

import jax
import jax.numpy as jnp
from jax.experimental import pallas as pl
from jax.experimental.pallas import tpu as pltpu


def _conv_stats_kernel(x_ref, w_ref, conv_ref, sum_ref, sumsq_ref, *, k):
    # x_ref:     (1, Hp, Wp, Cin)   spatially pre-padded input image (f32)
    # w_ref:     (k*k, Cin, C_pad)  conv taps, Cout zero-padded to C_pad lanes
    # conv_ref:  (1, H*W, C_pad)    lane-dense conv output for this image (f32)
    # sum_ref:   (1, 1, C_pad)      per-image per-channel sum partial
    # sumsq_ref: (1, 1, C_pad)      per-image per-channel sum-of-squares partial
    Hp, Wp, Cin = x_ref.shape[1], x_ref.shape[2], x_ref.shape[3]
    C_pad = w_ref.shape[2]
    H, W = Hp - (k - 1), Wp - (k - 1)

    acc = jnp.zeros((H * W, C_pad), jnp.float32)
    # Convolution (stride=1) as k*k shifted-window matmuls over the whole image,
    # each using the full 128-lane MXU output width.
    for dy in range(k):
        for dx in range(k):
            patch = x_ref[0, dy:dy + H, dx:dx + W, :].reshape(H * W, Cin)
            acc += jnp.dot(patch, w_ref[dy * k + dx],
                           preferred_element_type=jnp.float32)

    conv_ref[0] = acc
    sum_ref[0] = jnp.sum(acc, axis=0, keepdims=True)
    sumsq_ref[0] = jnp.sum(acc * acc, axis=0, keepdims=True)


def _bn_relu_kernel(conv_ref, sum_ref, sumsq_ref, gamma_ref, beta_ref, o_ref,
                    *, inv_count, eps):
    # conv_ref / o_ref: (TR, C_pad); sum/sumsq/gamma/beta: (1, C_pad)
    # Fold training-mode BN (batch stats, biased variance) in the prologue.
    mean = sum_ref[...] * inv_count
    var = sumsq_ref[...] * inv_count - mean * mean
    inv_std = jax.lax.rsqrt(var + eps)
    scale = gamma_ref[...] * inv_std
    shift = beta_ref[...] - mean * scale
    y = conv_ref[...] * scale + shift
    o_ref[...] = jnp.maximum(y, 0.0).astype(o_ref.dtype)


def conv_basic_forward(x_nchw, weight_oihw, gamma, beta, *, padding=1, eps=1e-5):
    """Equivalent of ConvBasic.forward (k=3, s=1, p=1, bias=False, BN in train mode)."""
    N, Cin, H, W = x_nchw.shape
    Cout, _, k, _ = weight_oihw.shape
    p = padding
    C_pad = max(128, ((Cout + 127) // 128) * 128)

    # NHWC, spatially pre-padded input; HWIO weights zero-padded along Cout.
    x = jnp.transpose(x_nchw, (0, 2, 3, 1)).astype(jnp.float32)
    x = jnp.pad(x, ((0, 0), (p, p), (p, p), (0, 0)))
    Hp, Wp = H + 2 * p, W + 2 * p

    w = jnp.transpose(weight_oihw, (2, 3, 1, 0)).astype(jnp.float32)     # (k,k,Cin,Cout)
    w = jnp.pad(w, ((0, 0), (0, 0), (0, 0), (0, C_pad - Cout)))
    w = w.reshape(k * k, Cin, C_pad)

    gamma_p = jnp.pad(gamma.astype(jnp.float32), (0, C_pad - Cout)).reshape(1, C_pad)
    beta_p = jnp.pad(beta.astype(jnp.float32), (0, C_pad - Cout)).reshape(1, C_pad)

    # ---- Kernel A: conv (lane-dense) + per-image channel stat partials ----
    conv_out, psum, psumsq = pl.pallas_call(
        functools.partial(_conv_stats_kernel, k=k),
        out_shape=(
            jax.ShapeDtypeStruct((N, H * W, C_pad), jnp.float32),
            jax.ShapeDtypeStruct((N, 1, C_pad), jnp.float32),
            jax.ShapeDtypeStruct((N, 1, C_pad), jnp.float32),
        ),
        grid_spec=pltpu.PrefetchScalarGridSpec(
            num_scalar_prefetch=0,
            grid=(N,),
            in_specs=[
                pl.BlockSpec((1, Hp, Wp, Cin), lambda n: (n, 0, 0, 0)),
                pl.BlockSpec((k * k, Cin, C_pad), lambda n: (0, 0, 0)),
            ],
            out_specs=[
                pl.BlockSpec((1, H * W, C_pad), lambda n: (n, 0, 0)),
                pl.BlockSpec((1, 1, C_pad), lambda n: (n, 0, 0)),
                pl.BlockSpec((1, 1, C_pad), lambda n: (n, 0, 0)),
            ],
        ),
        compiler_params=pltpu.CompilerParams(
            dimension_semantics=("parallel",)),
    )(x, w)

    # Tiny cross-batch reduce of the per-image partial stats.
    ch_sum = jnp.sum(psum, axis=0)      # (1, C_pad)
    ch_sumsq = jnp.sum(psumsq, axis=0)  # (1, C_pad)

    # ---- Kernel B: fused BN-fold + affine + ReLU on a flat lane-dense view ----
    rows = N * H * W
    conv_flat = conv_out.reshape(rows, C_pad)
    TR = min(rows, 1024)
    inv_count = 1.0 / float(rows)       # BN count = N*H*W

    out_flat = pl.pallas_call(
        functools.partial(_bn_relu_kernel, inv_count=inv_count, eps=float(eps)),
        out_shape=jax.ShapeDtypeStruct((rows, C_pad), x_nchw.dtype),
        grid_spec=pltpu.PrefetchScalarGridSpec(
            num_scalar_prefetch=0,
            grid=(pl.cdiv(rows, TR),),
            in_specs=[
                pl.BlockSpec((TR, C_pad), lambda r: (r, 0)),
                pl.BlockSpec((1, C_pad), lambda r: (0, 0)),
                pl.BlockSpec((1, C_pad), lambda r: (0, 0)),
                pl.BlockSpec((1, C_pad), lambda r: (0, 0)),
                pl.BlockSpec((1, C_pad), lambda r: (0, 0)),
            ],
            out_specs=pl.BlockSpec((TR, C_pad), lambda r: (r, 0)),
        ),
        compiler_params=pltpu.CompilerParams(
            dimension_semantics=("parallel",)),
    )(conv_flat, ch_sum, ch_sumsq, gamma_p, beta_p)

    out = out_flat.reshape(N, H, W, C_pad)[..., :Cout]
    return jnp.transpose(out, (0, 3, 1, 2))             # back to NCHW


def _reference(x_nchw, weight_oihw, gamma, beta, eps=1e-5):
    conv = jax.lax.conv_general_dilated(
        x_nchw, weight_oihw, window_strides=(1, 1), padding=[(1, 1), (1, 1)],
        dimension_numbers=("NCHW", "OIHW", "NCHW"))
    mean = conv.mean(axis=(0, 2, 3), keepdims=True)
    var = conv.var(axis=(0, 2, 3), keepdims=True)
    y = (conv - mean) / jnp.sqrt(var + eps)
    y = y * gamma.reshape(1, -1, 1, 1) + beta.reshape(1, -1, 1, 1)
    return jnp.maximum(y, 0.0)


if __name__ == "__main__":
    # Small shapes consistent with ConvBasic: NCHW input, chanIn=4, chanOut=8.
    N, Cin, H, W = 2, 4, 16, 16
    Cout, k = 8, 3

    key = jax.random.PRNGKey(0)
    kx, kw, kg, kb = jax.random.split(key, 4)
    x = jax.random.normal(kx, (N, Cin, H, W), dtype=jnp.float32)
    weight = jax.random.normal(kw, (Cout, Cin, k, k), dtype=jnp.float32) * 0.1
    gamma = 1.0 + 0.1 * jax.random.normal(kg, (Cout,), dtype=jnp.float32)
    beta = 0.1 * jax.random.normal(kb, (Cout,), dtype=jnp.float32)

    out = conv_basic_forward(x, weight, gamma, beta)
    out = jax.block_until_ready(out)

    ref = _reference(x, weight, gamma, beta)
    assert out.shape == (N, Cout, H, W), out.shape
    assert jnp.allclose(out, ref, rtol=1e-3, atol=1e-3), \
        float(jnp.max(jnp.abs(out - ref)))

    print("KERNEL_OK")
</pallas_src>

<mosaic_0001>
module attributes {stable_mosaic.version = 11 : i64} {
  func.func @_conv_stats_kernel(%arg0: i32, %arg1: memref<1x18x18x4xf32, #tpu.memory_space<vmem>>, %arg2: memref<9x4x128xf32, #tpu.memory_space<vmem>>, %arg3: memref<1x256x128xf32, #tpu.memory_space<vmem>>, %arg4: memref<1x1x128xf32, #tpu.memory_space<vmem>>, %arg5: memref<1x1x128xf32, #tpu.memory_space<vmem>>) attributes {dimension_semantics = [#tpu.dimension_semantics<parallel>], iteration_bounds = array<i64: 2>, scalar_prefetch = 0 : i64, scratch_operands = 0 : i64, tpu.core_type = #tpu.core_type<tc>, window_params = [{transform_indices = @transform_0, window_bounds = array<i64: 1, 18, 18, 4>}, {pipeline_mode = #tpu.pipeline_mode<synchronous>, transform_indices = @transform_1, window_bounds = array<i64: 9, 4, 128>}, {transform_indices = @transform_2, window_bounds = array<i64: 1, 256, 128>}, {transform_indices = @transform_3, window_bounds = array<i64: 1, 1, 128>}, {transform_indices = @transform_4, window_bounds = array<i64: 1, 1, 128>}]} {
    %cst = arith.constant 0.000000e+00 : f32
    %0 = vector.broadcast %cst : f32 to vector<256x128xf32>
    %c0 = arith.constant 0 : index
    %c0_0 = arith.constant 0 : index
    %c0_1 = arith.constant 0 : index
    %c0_2 = arith.constant 0 : index
    %1 = vector.load %arg1[%c0, %c0_0, %c0_1, %c0_2] : memref<1x18x18x4xf32, #tpu.memory_space<vmem>>, vector<1x16x16x4xf32>
    %2 = vector.shape_cast %1 : vector<1x16x16x4xf32> to vector<16x16x4xf32>
    %3 = vector.shape_cast %2 : vector<16x16x4xf32> to vector<256x4xf32>
    %c0_3 = arith.constant 0 : index
    %c0_4 = arith.constant 0 : index
    %c0_5 = arith.constant 0 : index
    %4 = vector.load %arg2[%c0_3, %c0_4, %c0_5] : memref<9x4x128xf32, #tpu.memory_space<vmem>>, vector<1x4x128xf32>
    %5 = vector.shape_cast %4 : vector<1x4x128xf32> to vector<4x128xf32>
    %cst_6 = arith.constant dense<0.000000e+00> : vector<256x128xf32>
    %6 = tpu.matmul %3, %5, %cst_6 {dimension_numbers = #tpu.dot_dimension_numbers<[1], [0], [0], [1], [0, 0, 1, 1], [], []>} : vector<256x4xf32>, vector<4x128xf32>, vector<256x128xf32> -> vector<256x128xf32>
    %7 = arith.addf %0, %6 : vector<256x128xf32>
    %c0_7 = arith.constant 0 : index
    %c0_8 = arith.constant 0 : index
    %c1 = arith.constant 1 : index
    %c0_9 = arith.constant 0 : index
    %8 = vector.load %arg1[%c0_7, %c0_8, %c1, %c0_9] : memref<1x18x18x4xf32, #tpu.memory_space<vmem>>, vector<1x16x16x4xf32>
    %9 = vector.shape_cast %8 : vector<1x16x16x4xf32> to vector<16x16x4xf32>
    %10 = vector.shape_cast %9 : vector<16x16x4xf32> to vector<256x4xf32>
    %c1_10 = arith.constant 1 : index
    %c0_11 = arith.constant 0 : index
    %c0_12 = arith.constant 0 : index
    %11 = vector.load %arg2[%c1_10, %c0_11, %c0_12] : memref<9x4x128xf32, #tpu.memory_space<vmem>>, vector<1x4x128xf32>
    %12 = vector.shape_cast %11 : vector<1x4x128xf32> to vector<4x128xf32>
    %cst_13 = arith.constant dense<0.000000e+00> : vector<256x128xf32>
    %13 = tpu.matmul %10, %12, %cst_13 {dimension_numbers = #tpu.dot_dimension_numbers<[1], [0], [0], [1], [0, 0, 1, 1], [], []>} : vector<256x4xf32>, vector<4x128xf32>, vector<256x128xf32> -> vector<256x128xf32>
    %14 = arith.addf %7, %13 : vector<256x128xf32>
    %c0_14 = arith.constant 0 : index
    %c0_15 = arith.constant 0 : index
    %c2 = arith.constant 2 : index
    %c0_16 = arith.constant 0 : index
    %15 = vector.load %arg1[%c0_14, %c0_15, %c2, %c0_16] : memref<1x18x18x4xf32, #tpu.memory_space<vmem>>, vector<1x16x16x4xf32>
    %16 = vector.shape_cast %15 : vector<1x16x16x4xf32> to vector<16x16x4xf32>
    %17 = vector.shape_cast %16 : vector<16x16x4xf32> to vector<256x4xf32>
    %c2_17 = arith.constant 2 : index
    %c0_18 = arith.constant 0 : index
    %c0_19 = arith.constant 0 : index
    %18 = vector.load %arg2[%c2_17, %c0_18, %c0_19] : memref<9x4x128xf32, #tpu.memory_space<vmem>>, vector<1x4x128xf32>
    %19 = vector.shape_cast %18 : vector<1x4x128xf32> to vector<4x128xf32>
    %cst_20 = arith.constant dense<0.000000e+00> : vector<256x128xf32>
    %20 = tpu.matmul %17, %19, %cst_20 {dimension_numbers = #tpu.dot_dimension_numbers<[1], [0], [0], [1], [0, 0, 1, 1], [], []>} : vector<256x4xf32>, vector<4x128xf32>, vector<256x128xf32> -> vector<256x128xf32>
    %21 = arith.addf %14, %20 : vector<256x128xf32>
    %c0_21 = arith.constant 0 : index
    %c1_22 = arith.constant 1 : index
    %c0_23 = arith.constant 0 : index
    %c0_24 = arith.constant 0 : index
    %22 = vector.load %arg1[%c0_21, %c1_22, %c0_23, %c0_24] : memref<1x18x18x4xf32, #tpu.memory_space<vmem>>, vector<1x16x16x4xf32>
    %23 = vector.shape_cast %22 : vector<1x16x16x4xf32> to vector<16x16x4xf32>
    %24 = vector.shape_cast %23 : vector<16x16x4xf32> to vector<256x4xf32>
    %c3 = arith.constant 3 : index
    %c0_25 = arith.constant 0 : index
    %c0_26 = arith.constant 0 : index
    %25 = vector.load %arg2[%c3, %c0_25, %c0_26] : memref<9x4x128xf32, #tpu.memory_space<vmem>>, vector<1x4x128xf32>
    %26 = vector.shape_cast %25 : vector<1x4x128xf32> to vector<4x128xf32>
    %cst_27 = arith.constant dense<0.000000e+00> : vector<256x128xf32>
    %27 = tpu.matmul %24, %26, %cst_27 {dimension_numbers = #tpu.dot_dimension_numbers<[1], [0], [0], [1], [0, 0, 1, 1], [], []>} : vector<256x4xf32>, vector<4x128xf32>, vector<256x128xf32> -> vector<256x128xf32>
    %28 = arith.addf %21, %27 : vector<256x128xf32>
    %c0_28 = arith.constant 0 : index
    %c1_29 = arith.constant 1 : index
    %c1_30 = arith.constant 1 : index
    %c0_31 = arith.constant 0 : index
    %29 = vector.load %arg1[%c0_28, %c1_29, %c1_30, %c0_31] : memref<1x18x18x4xf32, #tpu.memory_space<vmem>>, vector<1x16x16x4xf32>
    %30 = vector.shape_cast %29 : vector<1x16x16x4xf32> to vector<16x16x4xf32>
    %31 = vector.shape_cast %30 : vector<16x16x4xf32> to vector<256x4xf32>
    %c4 = arith.constant 4 : index
    %c0_32 = arith.constant 0 : index
    %c0_33 = arith.constant 0 : index
    %32 = vector.load %arg2[%c4, %c0_32, %c0_33] : memref<9x4x128xf32, #tpu.memory_space<vmem>>, vector<1x4x128xf32>
    %33 = vector.shape_cast %32 : vector<1x4x128xf32> to vector<4x128xf32>
    %cst_34 = arith.constant dense<0.000000e+00> : vector<256x128xf32>
    %34 = tpu.matmul %31, %33, %cst_34 {dimension_numbers = #tpu.dot_dimension_numbers<[1], [0], [0], [1], [0, 0, 1, 1], [], []>} : vector<256x4xf32>, vector<4x128xf32>, vector<256x128xf32> -> vector<256x128xf32>
    %35 = arith.addf %28, %34 : vector<256x128xf32>
    %c0_35 = arith.constant 0 : index
    %c1_36 = arith.constant 1 : index
    %c2_37 = arith.constant 2 : index
    %c0_38 = arith.constant 0 : index
    %36 = vector.load %arg1[%c0_35, %c1_36, %c2_37, %c0_38] : memref<1x18x18x4xf32, #tpu.memory_space<vmem>>, vector<1x16x16x4xf32>
    %37 = vector.shape_cast %36 : vector<1x16x16x4xf32> to vector<16x16x4xf32>
    %38 = vector.shape_cast %37 : vector<16x16x4xf32> to vector<256x4xf32>
    %c5 = arith.constant 5 : index
    %c0_39 = arith.constant 0 : index
    %c0_40 = arith.constant 0 : index
    %39 = vector.load %arg2[%c5, %c0_39, %c0_40] : memref<9x4x128xf32, #tpu.memory_space<vmem>>, vector<1x4x128xf32>
    %40 = vector.shape_cast %39 : vector<1x4x128xf32> to vector<4x128xf32>
    %cst_41 = arith.constant dense<0.000000e+00> : vector<256x128xf32>
    %41 = tpu.matmul %38, %40, %cst_41 {dimension_numbers = #tpu.dot_dimension_numbers<[1], [0], [0], [1], [0, 0, 1, 1], [], []>} : vector<256x4xf32>, vector<4x128xf32>, vector<256x128xf32> -> vector<256x128xf32>
    %42 = arith.addf %35, %41 : vector<256x128xf32>
    %c0_42 = arith.constant 0 : index
    %c2_43 = arith.constant 2 : index
    %c0_44 = arith.constant 0 : index
    %c0_45 = arith.constant 0 : index
    %43 = vector.load %arg1[%c0_42, %c2_43, %c0_44, %c0_45] : memref<1x18x18x4xf32, #tpu.memory_space<vmem>>, vector<1x16x16x4xf32>
    %44 = vector.shape_cast %43 : vector<1x16x16x4xf32> to vector<16x16x4xf32>
    %45 = vector.shape_cast %44 : vector<16x16x4xf32> to vector<256x4xf32>
    %c6 = arith.constant 6 : index
    %c0_46 = arith.constant 0 : index
    %c0_47 = arith.constant 0 : index
    %46 = vector.load %arg2[%c6, %c0_46, %c0_47] : memref<9x4x128xf32, #tpu.memory_space<vmem>>, vector<1x4x128xf32>
    %47 = vector.shape_cast %46 : vector<1x4x128xf32> to vector<4x128xf32>
    %cst_48 = arith.constant dense<0.000000e+00> : vector<256x128xf32>
    %48 = tpu.matmul %45, %47, %cst_48 {dimension_numbers = #tpu.dot_dimension_numbers<[1], [0], [0], [1], [0, 0, 1, 1], [], []>} : vector<256x4xf32>, vector<4x128xf32>, vector<256x128xf32> -> vector<256x128xf32>
    %49 = arith.addf %42, %48 : vector<256x128xf32>
    %c0_49 = arith.constant 0 : index
    %c2_50 = arith.constant 2 : index
    %c1_51 = arith.constant 1 : index
    %c0_52 = arith.constant 0 : index
    %50 = vector.load %arg1[%c0_49, %c2_50, %c1_51, %c0_52] : memref<1x18x18x4xf32, #tpu.memory_space<vmem>>, vector<1x16x16x4xf32>
    %51 = vector.shape_cast %50 : vector<1x16x16x4xf32> to vector<16x16x4xf32>
    %52 = vector.shape_cast %51 : vector<16x16x4xf32> to vector<256x4xf32>
    %c7 = arith.constant 7 : index
    %c0_53 = arith.constant 0 : index
    %c0_54 = arith.constant 0 : index
    %53 = vector.load %arg2[%c7, %c0_53, %c0_54] : memref<9x4x128xf32, #tpu.memory_space<vmem>>, vector<1x4x128xf32>
    %54 = vector.shape_cast %53 : vector<1x4x128xf32> to vector<4x128xf32>
    %cst_55 = arith.constant dense<0.000000e+00> : vector<256x128xf32>
    %55 = tpu.matmul %52, %54, %cst_55 {dimension_numbers = #tpu.dot_dimension_numbers<[1], [0], [0], [1], [0, 0, 1, 1], [], []>} : vector<256x4xf32>, vector<4x128xf32>, vector<256x128xf32> -> vector<256x128xf32>
    %56 = arith.addf %49, %55 : vector<256x128xf32>
    %c0_56 = arith.constant 0 : index
    %c2_57 = arith.constant 2 : index
    %c2_58 = arith.constant 2 : index
    %c0_59 = arith.constant 0 : index
    %57 = vector.load %arg1[%c0_56, %c2_57, %c2_58, %c0_59] : memref<1x18x18x4xf32, #tpu.memory_space<vmem>>, vector<1x16x16x4xf32>
    %58 = vector.shape_cast %57 : vector<1x16x16x4xf32> to vector<16x16x4xf32>
    %59 = vector.shape_cast %58 : vector<16x16x4xf32> to vector<256x4xf32>
    %c8 = arith.constant 8 : index
    %c0_60 = arith.constant 0 : index
    %c0_61 = arith.constant 0 : index
    %60 = vector.load %arg2[%c8, %c0_60, %c0_61] : memref<9x4x128xf32, #tpu.memory_space<vmem>>, vector<1x4x128xf32>
    %61 = vector.shape_cast %60 : vector<1x4x128xf32> to vector<4x128xf32>
    %cst_62 = arith.constant dense<0.000000e+00> : vector<256x128xf32>
    %62 = tpu.matmul %59, %61, %cst_62 {dimension_numbers = #tpu.dot_dimension_numbers<[1], [0], [0], [1], [0, 0, 1, 1], [], []>} : vector<256x4xf32>, vector<4x128xf32>, vector<256x128xf32> -> vector<256x128xf32>
    %63 = arith.addf %56, %62 : vector<256x128xf32>
    %c0_63 = arith.constant 0 : index
    %c0_64 = arith.constant 0 : index
    %c0_65 = arith.constant 0 : index
    %64 = vector.load %arg3[%c0_63, %c0_64, %c0_65] : memref<1x256x128xf32, #tpu.memory_space<vmem>>, vector<1x256x128xf32>
    %65 = vector.shape_cast %64 : vector<1x256x128xf32> to vector<256x128xf32>
    %66 = vector.shape_cast %63 : vector<256x128xf32> to vector<1x256x128xf32>
    tpu.vector_store %arg3[%c0_63, %c0_64, %c0_65], %66 {strides = array<i32>} : memref<1x256x128xf32, #tpu.memory_space<vmem>>, vector<1x256x128xf32>,
    %cst_66 = arith.constant dense<0.000000e+00> : vector<128xf32>
    %67 = vector.multi_reduction <add>, %63, %cst_66 [0] : vector<256x128xf32> to vector<128xf32>
    %68 = vector.shape_cast %67 : vector<128xf32> to vector<1x128xf32>
    %c0_67 = arith.constant 0 : index
    %c0_68 = arith.constant 0 : index
    %c0_69 = arith.constant 0 : index
    %69 = vector.load %arg4[%c0_67, %c0_68, %c0_69] : memref<1x1x128xf32, #tpu.memory_space<vmem>>, vector<1x1x128xf32>
    %70 = vector.shape_cast %69 : vector<1x1x128xf32> to vector<1x128xf32>
    %71 = vector.shape_cast %68 : vector<1x128xf32> to vector<1x1x128xf32>
    tpu.vector_store %arg4[%c0_67, %c0_68, %c0_69], %71 {strides = array<i32>} : memref<1x1x128xf32, #tpu.memory_space<vmem>>, vector<1x1x128xf32>,
    %72 = arith.mulf %63, %63 : vector<256x128xf32>
    %cst_70 = arith.constant dense<0.000000e+00> : vector<128xf32>
    %73 = vector.multi_reduction <add>, %72, %cst_70 [0] : vector<256x128xf32> to vector<128xf32>
    %74 = vector.shape_cast %73 : vector<128xf32> to vector<1x128xf32>
    %c0_71 = arith.constant 0 : index
    %c0_72 = arith.constant 0 : index
    %c0_73 = arith.constant 0 : index
    %75 = vector.load %arg5[%c0_71, %c0_72, %c0_73] : memref<1x1x128xf32, #tpu.memory_space<vmem>>, vector<1x1x128xf32>
    %76 = vector.shape_cast %75 : vector<1x1x128xf32> to vector<1x128xf32>
    %77 = vector.shape_cast %74 : vector<1x128xf32> to vector<1x1x128xf32>
    tpu.vector_store %arg5[%c0_71, %c0_72, %c0_73], %77 {strides = array<i32>} : memref<1x1x128xf32, #tpu.memory_space<vmem>>, vector<1x1x128xf32>,
    return
  }
  func.func @transform_0(%arg0: i32) -> (i32, i32, i32, i32) {
    %c0_i32 = arith.constant 0 : i32
    %c0_i32_0 = arith.constant 0 : i32
    %c0_i32_1 = arith.constant 0 : i32
    %c0_i32_2 = arith.constant 0 : i32
    return %arg0, %c0_i32, %c0_i32_0, %c0_i32_1 : i32, i32, i32, i32
  }
  func.func @transform_1(%arg0: i32) -> (i32, i32, i32) {
    %c0_i32 = arith.constant 0 : i32
    %c0_i32_0 = arith.constant 0 : i32
    %c0_i32_1 = arith.constant 0 : i32
    %c0_i32_2 = arith.constant 0 : i32
    return %c0_i32, %c0_i32_0, %c0_i32_1 : i32, i32, i32
  }
  func.func @transform_2(%arg0: i32) -> (i32, i32, i32) {
    %c0_i32 = arith.constant 0 : i32
    %c0_i32_0 = arith.constant 0 : i32
    %c0_i32_1 = arith.constant 0 : i32
    return %arg0, %c0_i32, %c0_i32_0 : i32, i32, i32
  }
  func.func @transform_3(%arg0: i32) -> (i32, i32, i32) {
    %c0_i32 = arith.constant 0 : i32
    %c0_i32_0 = arith.constant 0 : i32
    %c0_i32_1 = arith.constant 0 : i32
    return %arg0, %c0_i32, %c0_i32_0 : i32, i32, i32
  }
  func.func @transform_4(%arg0: i32) -> (i32, i32, i32) {
    %c0_i32 = arith.constant 0 : i32
    %c0_i32_0 = arith.constant 0 : i32
    %c0_i32_1 = arith.constant 0 : i32
    return %arg0, %c0_i32, %c0_i32_0 : i32, i32, i32
  }
}

</mosaic_0001>

<bundles_post_ra>
// kernel: tpu_custom_call.1
= control target key start
LH: loop header
LB: loop body
LE: loop exit
PB: predicated region body
PF: predicated region fallthrough
CT: control target
= control target key end

     0   :  { %10 = vsyncpa [#allocation3], 0  ;;  %s6844_s0 = inlined_call_operand.vmem [shape: f32[2,18,18,4], index: 0, kind: input, shape index: {}]   ;;  %s6845_s1 = inlined_call_operand.vmem [shape: f32[9,4,128], index: 1, kind: input, shape index: {}]   ;;  %s6846_s2 = inlined_call_operand.hbm [shape: f32[2,256,128], index: 2, kind: output, shape index: {0}]   ;;  %s6847_s3 = inlined_call_operand.hbm [shape: f32[2,1,128], index: 3, kind: output, shape index: {1}]   ;;  %s6848_s4 = inlined_call_operand.hbm [shape: f32[2,1,128], index: 4, kind: output, shape index: {2}]  }
   0x1   :  { %12 = vsyncpa [#allocation3 + $0x1], 0 }
   0x2   :  { %13 = vsyncpa [#allocation5], 0 }
   0x3   :  { %15 = vsyncpa [#allocation5 + $0x1], 0  ;;  %s5686_s15 = smov 0   ;;  %s5688_s16 = smov 0  }
   0x4   :  { %s5690_s17 = smov 0   ;;  %s5692_s18 = smov 0  }
   0x5 LB: > { %s5707_s19 = sadd.s32 4294967295, %s5654_s18   ;;  %s3964_s20 = sadd.s32 4294967294, %s5654_s18   ;;  %s5654_s18 = sphi %s5692_s18, %s6963_s18   ;;  %s5650_s17 = sphi %s5690_s17, %s6962_s17   ;;  %s5646_s16 = sphi %s5688_s16, %s6961_s16   ;;  %s5642_s15 = sphi %s5686_s15, %s6960_s15  }
   0x6   : > { %s5711_s21 = sadd.s32 1, %s5654_s18   ;;  %s75_s22 = sadd.s32 1, %s5650_s17 }
   0x7   : > { %s72_s23 = ssub.s32 %s5654_s18, %s5711_s21  ;;  %p85_p0 = scmp.ne.s32.totalorder %s5650_s17, %s5646_s16 }
   0x8   : > { %p73_p1 = scmp.eq.s32.totalorder %s72_s23, 0  ;;  %p86_p2 = scmp.eq.s32.totalorder %s5707_s19, 1 }
   0x9   : > { %p91_p3 = scmp.ne.s32.totalorder %s5646_s16, %s5642_s15  ;;  %p92_p4 = scmp.eq.s32.totalorder %s3964_s20, 1 }
   0xa   : > { %s5724_s24 = scalar_select %p73_p1, %s5650_s17, %s75_s22  }
   0xb   : > { %p5726_p5 = por %p86_p2, %p85_p0  ;;  %p5730_p6 = por %p92_p4, %p91_p3 }
   0xc   : > { %p3967_p7 = scmp.ge.s32.totalorder %s5654_s18, 1  ;;  %p173_p8 = scmp.lt.s32.totalorder %s5654_s18, 3 }
   0xe   : > { %p174_p9 = pnand %p3967_p7, %p173_p8 }
  0x10   : > { %177 = sbr.rel (%p174_p9) target bundleno = 595 (0x253), region = 28 }
  0x17   : > { %v3970_v0 = vld [vmem:[%s6845_s1 + $0x4] sm:$0xf]  ;;  %vm376_vm0 = vcmask 1043456   ;;  %v5742_v1 = vld [vmem:[%s6845_s1 + $0x10] sm:$0xf]  ;;  %p207_p10 = scmp.lt.s32.totalorder %s5707_s19, 1 }
  0x18   : > { %4772 = vmatprep.subr.msk.mxu1 %vm376_vm0, %v3970_v0  ;;  %4972 = vmatprep.subr.msk.mxu0 %vm376_vm0, %v5742_v1  ;;  %v244_v2 = vld [vmem:[%s6845_s1] sm:$0xf]  ;;  %v4235_v3 = vld [vmem:[%s6845_s1 + $0x14] sm:$0xf]  ;;  %vm279_vm1 = vcmask 31744   ;;  %s6677_s8 = sand.u32 1, %s5646_s16  }
  0x19   : > { %4773 = vmatpush3.msk.msra.mxu1 %vm376_vm0, %v3970_v0  ;;  %4973 = vmatpush3.msk.msra.mxu0 %vm376_vm0, %v5742_v1  ;;  %s208_s9 = scalar_select %p207_p10, %s5707_s19, 1  ;;  %v4301_v9 = vld [vmem:[%s6845_s1 + $0x18] sm:$0xf]  ;;  %v5782_v10 = vld [vmem:[%s6845_s1 + $0x8] sm:$0xf] }
  0x1a   : > { %4822 = vmatprep.subr.msk.mxu1 %vm376_vm0, %v244_v2  ;;  %5022 = vmatprep.subr.msk.mxu0 %vm376_vm0, %v4235_v3  ;;  %v5901_v28 = vld [vmem:[%s6845_s1 + $0x1c] sm:$0xf]  ;;  %v6064_v61 = vld [vmem:[%s6845_s1 + $0xc] sm:$0xf]  ;;  %s4474_s11 = sshll.u32 %s5707_s19, 12  ;;  %s3802_s23 = scalar_lea.sflag [#allocation3], %s6677_s8 }
  0x1b   : > { %s5480_s10 = smul.u32 432, %s208_s9  ;;  %s3968_s9 = sshll.u32 %s6677_s8, 8 }
  0x1c   : > { %s6727_s22 = scalar_lea.hbm %s6846_s2, %s4474_s11  ;;  %s5656_s28 = smov [#allocation2]  }
  0x1d   : > { %s5763_s13 = scalar_lea.vmem %s6844_s0, %s5480_s10  ;;  %s6684_s10 = scalar_lea.vmem [#allocation2], %s3968_s9 }
  0x1e   : > { %v245_v4 = vld [vmem:[%s5763_s13 + $0x1] sm:$0xff]  ;;  %v4137_v5 = vld [vmem:[%s5763_s13 + $0x19] sm:$0xff]  ;;  %v246_v6 = vld [vmem:[%s5763_s13 + $0x9] sm:$0xff]  ;;  %s3823_s12 = sshll.u32 %s6684_s10, 4  ;;  %s5536_s29 = sshll.u32 %s5656_s28, 4  ;;  %s6729_s12 = int_to_ptr.vmem [resolvable:$true] %s3823_s12  ;;  %s5537_s29 = int_to_ptr.vmem [resolvable:$false] %s5536_s29 }
  0x1f   : > { %4774 = vmatprep.mubr.msk.f32.mxu1 %vm279_vm1, %v245_v4  ;;  %4974 = vmatprep.mubr.msk.f32.mxu0 %vm279_vm1, %v4137_v5  ;;  %v4138_v7 = vld [vmem:[%s5763_s13 + $0x21] sm:$0xff]  ;;  %v5772_v8 = vld [vmem:[%s5763_s13 + $0x31] sm:$0xff]  ;;  %v5787_v11 = vld [vmem:[%s5763_s13 + $0x39] sm:$0xff]  ;;  %s5532_s27 = scalar_lea.vmem %s6729_s12, 4096  ;;  %s5538_s30 = scalar_lea.vmem %s5537_s29, 8192 }
  0x20   : > { %4775 = vmatmul.mubr.msk.f32.vlgmr.msra.gmra.mrb[0].mxu1 %vm279_vm1, %v246_v6  ;;  %4975 = vmatmul.mubr.msk.f32.vlgmr.msra.gmra.mrb[0].mxu0 %vm279_vm1, %v4138_v7  ;;  %v5793_v12 = vld [vmem:[%s5763_s13 + $0x49] sm:$0xff]  ;;  %v5806_v13 = vld [vmem:[%s5763_s13 + $0x51] sm:$0xff]  ;;  %v5809_v14 = vld [vmem:[%s5763_s13 + $0x61] sm:$0xff]  ;;  %p5533_p11 = scmp.ne.s32.totalorder %s6729_s12, %s5532_s27  ;;  %p5539_p0 = scmp.lt.s32.totalorder %s6729_s12, %s5537_s29 }
  0x21   : > { %4823 = vmatpush3.msk.msra.mxu1 %vm376_vm0, %v244_v2  ;;  %5023 = vmatpush3.msk.msra.mxu0 %vm376_vm0, %v4235_v3  ;;  %v5820_v15 = vld [vmem:[%s5763_s13 + $0x69] sm:$0xff]  ;;  %v5823_v16 = vld [vmem:[%s5763_s13 + $0x79] sm:$0xff]  ;;  %v5834_v17 = vld [vmem:[%s5763_s13 + $0x81] sm:$0xff]  ;;  %p5540_p1 = scmp.lt.s32.totalorder %s5538_s30, %s5532_s27 }
  0x22   : > { %4777 = vmatprep.mubr.msk.f32.mxu1 %vm279_vm1, %v4137_v5  ;;  %4977 = vmatprep.mubr.msk.f32.mxu0 %vm279_vm1, %v5772_v8  ;;  %v5837_v18 = vld [vmem:[%s5763_s13 + $0x91] sm:$0xff]  ;;  %v5848_v19 = vld [vmem:[%s5763_s13 + $0x99] sm:$0xff]  ;;  %v5851_v20 = vld [vmem:[%s5763_s13 + $0xa9] sm:$0xff]  ;;  %p5534_p12 = pnand %p5533_p11, %p5726_p5 }
  0x23   : > { %5072 = vmatprep.subr.msk.mxu0 %vm376_vm0, %v4301_v9  ;;  %4872 = vmatprep.subr.msk.mxu1 %vm376_vm0, %v5782_v10  ;;  %v5862_v21 = vld [vmem:[%s5763_s13 + $0xb1] sm:$0xff]  ;;  %v5865_v22 = vld [vmem:[%s5763_s13 + $0xc1] sm:$0xff]  ;;  %v5876_v23 = vld [vmem:[%s5763_s13 + $0xc9] sm:$0xff]  ;;  %p5541_p2 = por %p5540_p1, %p5539_p0 }
  0x24   : > { %4778 = vmatmul.mubr.msk.f32.gmra.mrb[2].mxu1 %vm279_vm1, %v4138_v7  ;;  %4978 = vmatmul.mubr.msk.f32.gmra.mrb[2].mxu0 %vm279_vm1, %v5787_v11  ;;  %v5879_v24 = vld [vmem:[%s5763_s13 + $0x1a] sm:$0xff]  ;;  %v5890_v25 = vld [vmem:[%s5763_s13 + $0x22] sm:$0xff]  ;;  %v5896_v27 = vld [vmem:[%s5763_s13 + $0x32] sm:$0xff]  ;;  %p5535_p13 = pneg %p5534_p12 }
  0x25   : > { %4780 = vmatprep.mubr.msk.f32.mxu1 %vm279_vm1, %v5772_v8  ;;  %4980 = vmatprep.mubr.msk.f32.mxu0 %vm279_vm1, %v5793_v12  ;;  %v5893_v26 = vld [vmem:[%s5763_s13 + $0xd9] sm:$0xff]  ;;  %v5911_v29 = vld [vmem:[%s5763_s13 + $0xe1] sm:$0xff]  ;;  %v5919_v31 = vld [vmem:[%s5763_s13 + $0xf1] sm:$0xff] }
  0x26   : > { %6896 = vst [vmem:[#allocation9_spill] sm:$0xff] %v5911_v29  ;;  %v5914_v30 = vld [vmem:[%s5763_s13 + $0x3a] sm:$0xff]  ;;  %6897 = vst [vmem:[#allocation10_spill] sm:$0xff] %v5919_v31  ;;  %v5922_v32 = vld [vmem:[%s5763_s13 + $0x4a] sm:$0xff]  ;;  %p5542_p3 = pnand %p5541_p2, %p5535_p13 }
  0x27   : > { %v5935_v33 = vld [vmem:[%s5763_s13 + $0xf9] sm:$0xff]  ;;  %v5941_v35 = vld [vmem:[%s5763_s13 + $0x109] sm:$0xff]  ;;  %v5955_v37 = vld [vmem:[%s5763_s13 + $0x111] sm:$0xff] }
  0x28   : > { %4781 = vmatmul.mubr.msk.f32.gmra.mrb[4].mxu1 %vm279_vm1, %v5787_v11  ;;  %4981 = vmatmul.mubr.msk.f32.gmra.mrb[4].mxu0 %vm279_vm1, %v5806_v13  ;;  %6898 = vst [vmem:[#allocation11_spill] sm:$0xff] %v5935_v33  ;;  %v5938_v34 = vld [vmem:[%s5763_s13 + $0x52] sm:$0xff]  ;;  %6899 = vst [vmem:[#allocation12_spill] sm:$0xff] %v5941_v35  ;;  %v5944_v36 = vld [vmem:[%s5763_s13 + $0x62] sm:$0xff] }
  0x29   : > { %4783 = vmatprep.mubr.msk.f32.mxu1 %vm279_vm1, %v5793_v12  ;;  %4983 = vmatprep.mubr.msk.f32.mxu0 %vm279_vm1, %v5809_v14  ;;  %6900 = vst [vmem:[#allocation13_spill] sm:$0xff] %v5955_v37  ;;  %v5958_v38 = vld [vmem:[%s5763_s13 + $0x6a] sm:$0xff]  ;;  %v5961_v39 = vld [vmem:[%s5763_s13 + $0x121] sm:$0xff]  ;;  %v5981_v43 = vld [vmem:[%s5763_s13 + $0x139] sm:$0xff] }
  0x2a   : > { %6901 = vst [vmem:[#allocation14_spill] sm:$0xff] %v5961_v39  ;;  %v5964_v40 = vld [vmem:[%s5763_s13 + $0x7a] sm:$0xff]  ;;  %v5975_v41 = vld [vmem:[%s5763_s13 + $0x129] sm:$0xff]  ;;  %6903 = vst [vmem:[#allocation16_spill] sm:$0xff] %v5981_v43 }
  0x2b   : > { %6902 = vst [vmem:[#allocation15_spill] sm:$0xff] %v5975_v41  ;;  %v5978_v42 = vld [vmem:[%s5763_s13 + $0x82] sm:$0xff]  ;;  %v5984_v44 = vld [vmem:[%s5763_s13 + $0x92] sm:$0xff]  ;;  %v5998_v46 = vld [vmem:[%s5763_s13 + $0x9a] sm:$0xff] }
  0x2c   : > { %4784 = vmatmul.mubr.msk.f32.gmra.mrb[6].mxu1 %vm279_vm1, %v5806_v13  ;;  %4984 = vmatmul.mubr.msk.f32.gmra.mrb[6].mxu0 %vm279_vm1, %v5820_v15  ;;  %v5995_v45 = vld [vmem:[%s5763_s13 + $0x141] sm:$0xff]  ;;  %v6001_v47 = vld [vmem:[%s5763_s13 + $0x151] sm:$0xff]  ;;  %v6015_v49 = vld [vmem:[%s5763_s13 + $0x159] sm:$0xff] }
  0x2d   : > { %4786 = vmatprep.mubr.msk.f32.mxu1 %vm279_vm1, %v5809_v14  ;;  %4986 = vmatprep.mubr.msk.f32.mxu0 %vm279_vm1, %v5823_v16  ;;  %6904 = vst [vmem:[#allocation17_spill] sm:$0xff] %v5995_v45  ;;  %6905 = vst [vmem:[#allocation18_spill] sm:$0xff] %v6001_v47  ;;  %v6004_v48 = vld [vmem:[%s5763_s13 + $0xaa] sm:$0xff]  ;;  %v6018_v50 = vld [vmem:[%s5763_s13 + $0xb2] sm:$0xff] }
  0x2e   : > { %6906 = vst [vmem:[#allocation19_spill] sm:$0xff] %v6015_v49  ;;  %v6021_v51 = vld [vmem:[%s5763_s13 + $0x169] sm:$0xff]  ;;  %v6035_v53 = vld [vmem:[%s5763_s13 + $0x171] sm:$0xff]  ;;  %v212_v55 = vld [vmem:[%s5763_s13] sm:$0xff] }
  0x2f   : > { %6907 = vst [vmem:[#allocation20_spill] sm:$0xff] %v6021_v51  ;;  %v6024_v52 = vld [vmem:[%s5763_s13 + $0xc2] sm:$0xff]  ;;  %6908 = vst [vmem:[#allocation21_spill] sm:$0xff] %v6035_v53  ;;  %v6038_v54 = vld [vmem:[%s5763_s13 + $0xca] sm:$0xff] }
  0x30   : > { %4787 = vmatmul.mubr.msk.f32.gmra.mrb[8].mxu1 %vm279_vm1, %v5820_v15  ;;  %4987 = vmatmul.mubr.msk.f32.gmra.mrb[8].mxu0 %vm279_vm1, %v5834_v17  ;;  %v6042_v56 = vld [vmem:[%s5763_s13 + $0xda] sm:$0xff]  ;;  %v213_v57 = vld [vmem:[%s5763_s13 + $0x8] sm:$0xff]  ;;  %v6059_v60 = vld [vmem:[%s5763_s13 + $0xf2] sm:$0xff] }
  0x31   : > { %4789 = vmatprep.mubr.msk.f32.mxu1 %vm279_vm1, %v5823_v16  ;;  %4989 = vmatprep.mubr.msk.f32.mxu0 %vm279_vm1, %v5837_v18  ;;  %v6053_v58 = vld [vmem:[%s5763_s13 + $0xe2] sm:$0xff]  ;;  %v6056_v59 = vld [vmem:[%s5763_s13 + $0x18] sm:$0xff]  ;;  %v6082_v0 = vld [vmem:[%s5763_s13 + $0x30] sm:$0xff] }
  0x32   : > { %6909 = vst [vmem:[#allocation22_spill] sm:$0xff] %v6056_v59  ;;  %v6074_v62 = vld [vmem:[%s5763_s13 + $0x20] sm:$0xff]  ;;  %6911 = vst [vmem:[#allocation24_spill] sm:$0xff] %v6082_v0  ;;  %v6085_v2 = vld [vmem:[%s5763_s13 + $0x10a] sm:$0xff] }
  0x33   : > { %6910 = vst [vmem:[#allocation23_spill] sm:$0xff] %v6074_v62  ;;  %v6077_v63 = vld [vmem:[%s5763_s13 + $0xfa] sm:$0xff]  ;;  %v6101_v4 = vld [vmem:[%s5763_s13 + $0x112] sm:$0xff]  ;;  %v6104_v5 = vld [vmem:[%s5763_s13 + $0x48] sm:$0xff] }
  0x34   : > { %4790 = vmatmul.mubr.msk.f32.gmra.mrb[10].mxu1 %vm279_vm1, %v5834_v17  ;;  %4990 = vmatmul.mubr.msk.f32.gmra.mrb[10].mxu0 %vm279_vm1, %v5848_v19  ;;  %v6098_v3 = vld [vmem:[%s5763_s13 + $0x38] sm:$0xff]  ;;  %6913 = vst [vmem:[#allocation26_spill] sm:$0xff] %v6104_v5  ;;  %v6107_v6 = vld [vmem:[%s5763_s13 + $0x122] sm:$0xff]  ;;  %v6118_v7 = vld [vmem:[%s5763_s13 + $0x50] sm:$0xff] }
  0x35   : > { %4792 = vmatprep.mubr.msk.f32.mxu1 %vm279_vm1, %v5837_v18  ;;  %4992 = vmatprep.mubr.msk.f32.mxu0 %vm279_vm1, %v5851_v20  ;;  %6912 = vst [vmem:[#allocation25_spill] sm:$0xff] %v6098_v3  ;;  %6914 = vst [vmem:[#allocation27_spill] sm:$0xff] %v6118_v7 }
  0x38   : > { %4793 = vmatmul.mubr.msk.f32.gmra.mrb[12].mxu1 %vm279_vm1, %v5848_v19  ;;  %4993 = vmatmul.mubr.msk.f32.gmra.mrb[12].mxu0 %vm279_vm1, %v5862_v21 }
  0x39   : > { %4795 = vmatprep.mubr.msk.f32.mxu1 %vm279_vm1, %v5851_v20  ;;  %4995 = vmatprep.mubr.msk.f32.mxu0 %vm279_vm1, %v5865_v22 }
  0x3c   : > { %4796 = vmatmul.mubr.msk.f32.gmra.mrb[14].mxu1 %vm279_vm1, %v5862_v21  ;;  %4996 = vmatmul.mubr.msk.f32.gmra.mrb[14].mxu0 %vm279_vm1, %v5876_v23 }
  0x3d   : > { %4798 = vmatprep.mubr.msk.f32.mxu1 %vm279_vm1, %v5865_v22  ;;  %5024 = vmatprep.mubr.msk.f32.mxu0 %vm279_vm1, %v5879_v24 }
  0x40   : > { %4799 = vmatmul.mubr.msk.f32.gmra.mrb[16].mxu1 %vm279_vm1, %v5876_v23  ;;  %5025 = vmatmul.mubr.msk.f32.vlgmr.msra.gmra.mrb[0].mxu0 %vm279_vm1, %v5890_v25 }
  0x41   : > { %5073 = vmatpush3.msk.msra.mxu0 %vm376_vm0, %v4301_v9  ;;  %4801 = vmatprep.mubr.msk.f32.mxu1 %vm279_vm1, %v5893_v26  ;;  %v6121_v9 = vld [vmem:[%s5763_s13 + $0x12a] sm:$0xff] }
  0x42   : > { %5027 = vmatprep.mubr.msk.f32.mxu0 %vm279_vm1, %v5896_v27  ;;  %5122 = vmatprep.subr.msk.mxu0 %vm376_vm0, %v5901_v28 }
  0x44   : > { %4802 = vmatmul.mubr.msk.f32.gmra.mrb[18].mxu1 %vm279_vm1, %v5911_v29  ;;  %5028 = vmatmul.mubr.msk.f32.gmra.mrb[2].mxu0 %vm279_vm1, %v5914_v30  ;;  %v6218_v29 = vld [vmem:[%s5763_s13 + $0xd8] sm:$0xff] }
  0x45   : > { %4804 = vmatprep.mubr.msk.f32.mxu1 %vm279_vm1, %v5919_v31  ;;  %5030 = vmatprep.mubr.msk.f32.mxu0 %vm279_vm1, %v5922_v32  ;;  %v6201_v31 = vld [vmem:[%s5763_s13 + $0x18a] sm:$0xff] }
  0x46   : > { %6925 = vst [vmem:[#allocation38_spill] sm:$0xff] %v6201_v31 }
  0x48   : > { %4805 = vmatmul.mubr.msk.f32.gmra.mrb[20].mxu1 %vm279_vm1, %v5935_v33  ;;  %5031 = vmatmul.mubr.msk.f32.gmra.mrb[4].mxu0 %vm279_vm1, %v5938_v34  ;;  %v6187_v33 = vld [vmem:[%s5763_s13 + $0x182] sm:$0xff] }
  0x49   : > { %4807 = vmatprep.mubr.msk.f32.mxu1 %vm279_vm1, %v5941_v35  ;;  %5033 = vmatprep.mubr.msk.f32.mxu0 %vm279_vm1, %v5944_v36  ;;  %v6184_v35 = vld [vmem:[%s5763_s13 + $0xa8] sm:$0xff]  ;;  %6923 = vst [vmem:[#allocation36_spill] sm:$0xff] %v6187_v33 }
  0x4a   : > { %6922 = vst [vmem:[#allocation35_spill] sm:$0xff] %v6184_v35 }
  0x4c   : > { %4808 = vmatmul.mubr.msk.f32.gmra.mrb[22].mxu1 %vm279_vm1, %v5955_v37  ;;  %5034 = vmatmul.mubr.msk.f32.gmra.mrb[6].mxu0 %vm279_vm1, %v5958_v38  ;;  %v6181_v37 = vld [vmem:[%s5763_s13 + $0x172] sm:$0xff] }
  0x4d   : > { %4810 = vmatprep.mubr.msk.f32.mxu1 %vm279_vm1, %v5961_v39  ;;  %5036 = vmatprep.mubr.msk.f32.mxu0 %vm279_vm1, %v5964_v40  ;;  %v6178_v39 = vld [vmem:[%s5763_s13 + $0x98] sm:$0xff]  ;;  %6921 = vst [vmem:[#allocation34_spill] sm:$0xff] %v6181_v37 }
  0x4e   : > { %6920 = vst [vmem:[#allocation33_spill] sm:$0xff] %v6178_v39 }
  0x50   : > { %4811 = vmatmul.mubr.msk.f32.gmra.mrb[24].mxu1 %vm279_vm1, %v5975_v41  ;;  %5037 = vmatmul.mubr.msk.f32.gmra.mrb[8].mxu0 %vm279_vm1, %v5978_v42  ;;  %v6167_v41 = vld [vmem:[%s5763_s13 + $0x16a] sm:$0xff] }
  0x51   : > { %4813 = vmatprep.mubr.msk.f32.mxu1 %vm279_vm1, %v5981_v43  ;;  %5039 = vmatprep.mubr.msk.f32.mxu0 %vm279_vm1, %v5984_v44  ;;  %v6164_v43 = vld [vmem:[%s5763_s13 + $0x90] sm:$0xff] }
  0x52   : > { %6919 = vst [vmem:[#allocation32_spill] sm:$0xff] %v6164_v43 }
  0x54   : > { %4814 = vmatmul.mubr.msk.f32.gmra.mrb[26].mxu1 %vm279_vm1, %v5995_v45  ;;  %5040 = vmatmul.mubr.msk.f32.gmra.mrb[10].mxu0 %vm279_vm1, %v5998_v46  ;;  %v6161_v45 = vld [vmem:[%s5763_s13 + $0x15a] sm:$0xff] }
  0x55   : > { %4816 = vmatprep.mubr.msk.f32.mxu1 %vm279_vm1, %v6001_v47  ;;  %5042 = vmatprep.mubr.msk.f32.mxu0 %vm279_vm1, %v6004_v48  ;;  %v6158_v47 = vld [vmem:[%s5763_s13 + $0x80] sm:$0xff] }
  0x56   : > { %6918 = vst [vmem:[#allocation31_spill] sm:$0xff] %v6158_v47 }
  0x58   : > { %4817 = vmatmul.mubr.msk.f32.gmra.mrb[28].mxu1 %vm279_vm1, %v6015_v49  ;;  %5043 = vmatmul.mubr.msk.f32.gmra.mrb[12].mxu0 %vm279_vm1, %v6018_v50  ;;  %v6147_v49 = vld [vmem:[%s5763_s13 + $0x152] sm:$0xff] }
  0x59   : > { %4819 = vmatprep.mubr.msk.f32.mxu1 %vm279_vm1, %v6021_v51  ;;  %5045 = vmatprep.mubr.msk.f32.mxu0 %vm279_vm1, %v6024_v52  ;;  %v6144_v51 = vld [vmem:[%s5763_s13 + $0x78] sm:$0xff] }
  0x5a   : > { %6917 = vst [vmem:[#allocation30_spill] sm:$0xff] %v6144_v51 }
  0x5c   : > { %4820 = vmatmul.mubr.msk.f32.gmra.mrb[30].mxu1 %vm279_vm1, %v6035_v53  ;;  %5046 = vmatmul.mubr.msk.f32.gmra.mrb[14].mxu0 %vm279_vm1, %v6038_v54  ;;  %v6141_v53 = vld [vmem:[%s5763_s13 + $0x142] sm:$0xff] }
  0x5d   : > { %4824 = vmatprep.mubr.msk.f32.mxu1 %vm279_vm1, %v212_v55  ;;  %5048 = vmatprep.mubr.msk.f32.mxu0 %vm279_vm1, %v6042_v56  ;;  %v6127_v55 = vld [vmem:[%s5763_s13 + $0x13a] sm:$0xff] }
  0x60   : > { %4825 = vmatmul.mubr.msk.f32.vlgmr.msra.gmra.mrb[0].mxu1 %vm279_vm1, %v213_v57  ;;  %5049 = vmatmul.mubr.msk.f32.gmra.mrb[16].mxu0 %vm279_vm1, %v6053_v58  ;;  %v6138_v57 = vld [vmem:[%s5763_s13 + $0x68] sm:$0xff] }
  0x61   : > { %4873 = vmatpush3.msk.msra.mxu1 %vm376_vm0, %v5782_v10  ;;  %4827 = vmatprep.mubr.msk.f32.mxu1 %vm279_vm1, %v6056_v59  ;;  %v6124_v10 = vld [vmem:[%s5763_s13 + $0x60] sm:$0xff]  ;;  %6916 = vst [vmem:[#allocation29_spill] sm:$0xff] %v6138_v57 }
  0x62   : > { %5051 = vmatprep.mubr.msk.f32.mxu0 %vm279_vm1, %v6059_v60  ;;  %4922 = vmatprep.subr.msk.mxu1 %vm376_vm0, %v6064_v61  ;;  %6915 = vst [vmem:[#allocation28_spill] sm:$0xff] %v6124_v10  ;;  %v6204_v59 = vld [vmem:[%s5763_s13 + $0xc0] sm:$0xff] }
  0x64   : > { %4828 = vmatmul.mubr.msk.f32.gmra.mrb[2].mxu1 %vm279_vm1, %v6074_v62  ;;  %5052 = vmatmul.mubr.msk.f32.gmra.mrb[18].mxu0 %vm279_vm1, %v6077_v63  ;;  %v6198_v62 = vld [vmem:[%s5763_s13 + $0xb0] sm:$0xff] }
  0x65   : > { %4830 = vmatprep.mubr.msk.f32.mxu1 %vm279_vm1, %v6082_v0  ;;  %5054 = vmatprep.mubr.msk.f32.mxu0 %vm279_vm1, %v6085_v2  ;;  %6924 = vst [vmem:[#allocation37_spill] sm:$0xff] %v6198_v62 }
  0x68   : > { %4831 = vmatmul.mubr.msk.f32.gmra.mrb[4].mxu1 %vm279_vm1, %v6098_v3  ;;  %5055 = vmatmul.mubr.msk.f32.gmra.mrb[20].mxu0 %vm279_vm1, %v6101_v4 }
  0x69   : > { %4833 = vmatprep.mubr.msk.f32.mxu1 %vm279_vm1, %v6104_v5  ;;  %5057 = vmatprep.mubr.msk.f32.mxu0 %vm279_vm1, %v6107_v6 }
  0x6c   : > { %4834 = vmatmul.mubr.msk.f32.gmra.mrb[6].mxu1 %vm279_vm1, %v6118_v7  ;;  %5058 = vmatmul.mubr.msk.f32.gmra.mrb[22].mxu0 %vm279_vm1, %v6121_v9 }
  0x6d   : > { %4836 = vmatprep.mubr.msk.f32.mxu1 %vm279_vm1, %v6124_v10  ;;  %5060 = vmatprep.mubr.msk.f32.mxu0 %vm279_vm1, %v6127_v55 }
  0x70   : > { %4837 = vmatmul.mubr.msk.f32.gmra.mrb[8].mxu1 %vm279_vm1, %v6138_v57  ;;  %5061 = vmatmul.mubr.msk.f32.gmra.mrb[24].mxu0 %vm279_vm1, %v6141_v53 }
  0x71   : > { %4839 = vmatprep.mubr.msk.f32.mxu1 %vm279_vm1, %v6144_v51  ;;  %5063 = vmatprep.mubr.msk.f32.mxu0 %vm279_vm1, %v6147_v49 }
  0x74   : > { %4840 = vmatmul.mubr.msk.f32.gmra.mrb[10].mxu1 %vm279_vm1, %v6158_v47  ;;  %5064 = vmatmul.mubr.msk.f32.gmra.mrb[26].mxu0 %vm279_vm1, %v6161_v45 }
  0x75   : > { %4842 = vmatprep.mubr.msk.f32.mxu1 %vm279_vm1, %v6164_v43  ;;  %5066 = vmatprep.mubr.msk.f32.mxu0 %vm279_vm1, %v6167_v41 }
  0x78   : > { %4843 = vmatmul.mubr.msk.f32.gmra.mrb[12].mxu1 %vm279_vm1, %v6178_v39  ;;  %5067 = vmatmul.mubr.msk.f32.gmra.mrb[28].mxu0 %vm279_vm1, %v6181_v37  ;;  %v6223_v37 = vld [vmem:[%s6845_s1 + $0x20] sm:$0xf] }
  0x79   : > { %4845 = vmatprep.mubr.msk.f32.mxu1 %vm279_vm1, %v6184_v35  ;;  %5069 = vmatprep.mubr.msk.f32.mxu0 %vm279_vm1, %v6187_v33  ;;  %v6215_v33 = vld [vmem:[%s5763_s13 + $0xc8] sm:$0xff] }
  0x7a   : > { %6926 = vst [vmem:[#allocation39_spill] sm:$0xff] %v6215_v33 }
  0x7c   : > { %4846 = vmatmul.mubr.msk.f32.gmra.mrb[14].mxu1 %vm279_vm1, %v6198_v62  ;;  %5070 = vmatmul.mubr.msk.f32.gmra.mrb[30].mxu0 %vm279_vm1, %v6201_v31  ;;  %v6234_v31 = vld [vmem:[%s5763_s13 + $0xe0] sm:$0xff] }
  0x7d   : > { %4848 = vmatprep.mubr.msk.f32.mxu1 %vm279_vm1, %v6204_v59  ;;  %5074 = vmatprep.mubr.msk.f32.mxu0 %vm279_vm1, %v6082_v0  ;;  %v6239_v0 = vld [vmem:[%s5763_s13 + $0xf0] sm:$0xff] }
  0x80   : > { %4849 = vmatmul.mubr.msk.f32.gmra.mrb[16].mxu1 %vm279_vm1, %v6215_v33  ;;  %5075 = vmatmul.mubr.msk.f32.vlgmr.msra.gmra.mrb[0].mxu0 %vm279_vm1, %v6098_v3  ;;  %v929_v3 = vld [vmem:[%s5763_s13 + $0x2] sm:$0xff] }
  0x81   : > { %5123 = vmatpush3.msk.msra.mxu0 %vm376_vm0, %v5901_v28  ;;  %4851 = vmatprep.mubr.msk.f32.mxu1 %vm279_vm1, %v6218_v29  ;;  %v6252_v28 = vld [vmem:[%s5763_s13 + $0xf8] sm:$0xff] }
  0x82   : > { %5077 = vmatprep.mubr.msk.f32.mxu0 %vm279_vm1, %v6104_v5  ;;  %5172 = vmatprep.subr.msk.mxu0 %vm376_vm0, %v6223_v37  ;;  %v6255_v5 = vld [vmem:[%s5763_s13 + $0x108] sm:$0xff] }
  0x84   : > { %4852 = vmatmul.mubr.msk.f32.gmra.mrb[18].mxu1 %vm279_vm1, %v6234_v31  ;;  %5078 = vmatmul.mubr.msk.f32.gmra.mrb[2].mxu0 %vm279_vm1, %v6118_v7  ;;  %v6266_v7 = vld [vmem:[%s5763_s13 + $0x110] sm:$0xff] }
  0x85   : > { %4854 = vmatprep.mubr.msk.f32.mxu1 %vm279_vm1, %v6239_v0  ;;  %5080 = vmatprep.mubr.msk.f32.mxu0 %vm279_vm1, %v6124_v10  ;;  %v6269_v10 = vld [vmem:[%s5763_s13 + $0x120] sm:$0xff] }
  0x88   : > { %4855 = vmatmul.mubr.msk.f32.gmra.mrb[20].mxu1 %vm279_vm1, %v6252_v28  ;;  %5081 = vmatmul.mubr.msk.f32.gmra.mrb[4].mxu0 %vm279_vm1, %v6138_v57  ;;  %v6280_v57 = vld [vmem:[%s5763_s13 + $0x128] sm:$0xff] }
  0x89   : > { %4857 = vmatprep.mubr.msk.f32.mxu1 %vm279_vm1, %v6255_v5  ;;  %5083 = vmatprep.mubr.msk.f32.mxu0 %vm279_vm1, %v6144_v51  ;;  %v6283_v51 = vld [vmem:[%s5763_s13 + $0x138] sm:$0xff] }
  0x8c   : > { %4858 = vmatmul.mubr.msk.f32.gmra.mrb[22].mxu1 %vm279_vm1, %v6266_v7  ;;  %5084 = vmatmul.mubr.msk.f32.gmra.mrb[6].mxu0 %vm279_vm1, %v6158_v47  ;;  %v6294_v47 = vld [vmem:[%s5763_s13 + $0x140] sm:$0xff] }
  0x8d   : > { %4860 = vmatprep.mubr.msk.f32.mxu1 %vm279_vm1, %v6269_v10  ;;  %5086 = vmatprep.mubr.msk.f32.mxu0 %vm279_vm1, %v6164_v43  ;;  %v6297_v43 = vld [vmem:[%s5763_s13 + $0x150] sm:$0xff] }
  0x90   : > { %4861 = vmatmul.mubr.msk.f32.gmra.mrb[24].mxu1 %vm279_vm1, %v6280_v57  ;;  %5087 = vmatmul.mubr.msk.f32.gmra.mrb[8].mxu0 %vm279_vm1, %v6178_v39  ;;  %v6308_v39 = vld [vmem:[%s5763_s13 + $0x158] sm:$0xff] }
  0x91   : > { %4863 = vmatprep.mubr.msk.f32.mxu1 %vm279_vm1, %v6283_v51  ;;  %5089 = vmatprep.mubr.msk.f32.mxu0 %vm279_vm1, %v6184_v35  ;;  %v6311_v35 = vld [vmem:[%s5763_s13 + $0x168] sm:$0xff] }
  0x94   : > { %4864 = vmatmul.mubr.msk.f32.gmra.mrb[26].mxu1 %vm279_vm1, %v6294_v47  ;;  %5090 = vmatmul.mubr.msk.f32.gmra.mrb[10].mxu0 %vm279_vm1, %v6198_v62  ;;  %v6322_v62 = vld [vmem:[%s5763_s13 + $0x170] sm:$0xff] }
  0x95   : > { %4866 = vmatprep.mubr.msk.f32.mxu1 %vm279_vm1, %v6297_v43  ;;  %5092 = vmatprep.mubr.msk.f32.mxu0 %vm279_vm1, %v6204_v59 }
  0x98   : > { %4867 = vmatmul.mubr.msk.f32.gmra.mrb[28].mxu1 %vm279_vm1, %v6308_v39  ;;  %5093 = vmatmul.mubr.msk.f32.gmra.mrb[12].mxu0 %vm279_vm1, %v6215_v33  ;;  %v930_v33 = vld [vmem:[%s5763_s13 + $0xa] sm:$0xff] }
  0x99   : > { %4869 = vmatprep.mubr.msk.f32.mxu1 %vm279_vm1, %v6311_v35  ;;  %5095 = vmatprep.mubr.msk.f32.mxu0 %vm279_vm1, %v6218_v29 }
  0x9c   : > { %4870 = vmatmul.mubr.msk.f32.gmra.mrb[30].mxu1 %vm279_vm1, %v6322_v62  ;;  %5096 = vmatmul.mubr.msk.f32.gmra.mrb[14].mxu0 %vm279_vm1, %v6234_v31 }
  0x9d   : > { %4874 = vmatprep.mubr.msk.f32.mxu1 %vm279_vm1, %v929_v3  ;;  %5098 = vmatprep.mubr.msk.f32.mxu0 %vm279_vm1, %v6239_v0  ;;  %v6943_v3 = vld [vmem:[#allocation29_spill] sm:$0xff] }
  0xa0   : > { %4875 = vmatmul.mubr.msk.f32.vlgmr.msra.gmra.mrb[0].mxu1 %vm279_vm1, %v930_v33  ;;  %5099 = vmatmul.mubr.msk.f32.gmra.mrb[16].mxu0 %vm279_vm1, %v6252_v28  ;;  %v4299_v33 = vld [vmem:[%s5763_s13 + $0x198] sm:$0xff] }
  0xa1   : > { %4923 = vmatpush3.msk.msra.mxu1 %vm376_vm0, %v6064_v61  ;;  %4877 = vmatprep.mubr.msk.f32.mxu1 %vm279_vm1, %v5879_v24  ;;  %v6377_v24 = vld [vmem:[%s5763_s13 + $0x180] sm:$0xff] }
  0xa2   : > { %5101 = vmatprep.mubr.msk.f32.mxu0 %vm279_vm1, %v6255_v5  ;;  %5222 = vmatprep.subr.msk.mxu1 %vm376_vm0, %v5742_v1  ;;  %v4300_v61 = vld [vmem:[%s5763_s13 + $0x1a0] sm:$0xff] }
  0xa4   : > { %4878 = vmatmul.mubr.msk.f32.gmra.mrb[2].mxu1 %vm279_vm1, %v5890_v25  ;;  %5102 = vmatmul.mubr.msk.f32.gmra.mrb[18].mxu0 %vm279_vm1, %v6266_v7  ;;  %v6388_v25 = vld [vmem:[%s5763_s13 + $0x188] sm:$0xff] }
  0xa5   : > { %4880 = vmatprep.mubr.msk.f32.mxu1 %vm279_vm1, %v5896_v27  ;;  %5104 = vmatprep.mubr.msk.f32.mxu0 %vm279_vm1, %v6269_v10 }
  0xa8   : > { %4881 = vmatmul.mubr.msk.f32.gmra.mrb[4].mxu1 %vm279_vm1, %v5914_v30  ;;  %5105 = vmatmul.mubr.msk.f32.gmra.mrb[20].mxu0 %vm279_vm1, %v6280_v57 }
  0xa9   : > { %4883 = vmatprep.mubr.msk.f32.mxu1 %vm279_vm1, %v5922_v32  ;;  %5107 = vmatprep.mubr.msk.f32.mxu0 %vm279_vm1, %v6283_v51 }
  0xac   : > { %4884 = vmatmul.mubr.msk.f32.gmra.mrb[6].mxu1 %vm279_vm1, %v5938_v34  ;;  %5108 = vmatmul.mubr.msk.f32.gmra.mrb[22].mxu0 %vm279_vm1, %v6294_v47 }
  0xad   : > { %4886 = vmatprep.mubr.msk.f32.mxu1 %vm279_vm1, %v5944_v36  ;;  %5110 = vmatprep.mubr.msk.f32.mxu0 %vm279_vm1, %v6297_v43 }
  0xb0   : > { %4887 = vmatmul.mubr.msk.f32.gmra.mrb[8].mxu1 %vm279_vm1, %v5958_v38  ;;  %5111 = vmatmul.mubr.msk.f32.gmra.mrb[24].mxu0 %vm279_vm1, %v6308_v39 }
  0xb1   : > { %4889 = vmatprep.mubr.msk.f32.mxu1 %vm279_vm1, %v5964_v40  ;;  %5113 = vmatprep.mubr.msk.f32.mxu0 %vm279_vm1, %v6311_v35 }
  0xb4   : > { %4890 = vmatmul.mubr.msk.f32.gmra.mrb[10].mxu1 %vm279_vm1, %v5978_v42  ;;  %5114 = vmatmul.mubr.msk.f32.gmra.mrb[26].mxu0 %vm279_vm1, %v6322_v62 }
  0xb5   : > { %4892 = vmatprep.mubr.msk.f32.mxu1 %vm279_vm1, %v5984_v44  ;;  %5116 = vmatprep.mubr.msk.f32.mxu0 %vm279_vm1, %v6377_v24 }
  0xb8   : > { %4893 = vmatmul.mubr.msk.f32.gmra.mrb[12].mxu1 %vm279_vm1, %v5998_v46  ;;  %5117 = vmatmul.mubr.msk.f32.gmra.mrb[28].mxu0 %vm279_vm1, %v6388_v25 }
  0xb9   : > { %4895 = vmatprep.mubr.msk.f32.mxu1 %vm279_vm1, %v6004_v48  ;;  %5119 = vmatprep.mubr.msk.f32.mxu0 %vm279_vm1, %v4299_v33  ;;  %v6944_v33 = vld [vmem:[#allocation17_spill] sm:$0xff] }
  0xbc   : > { %4896 = vmatmul.mubr.msk.f32.gmra.mrb[14].mxu1 %vm279_vm1, %v6018_v50  ;;  %5120 = vmatmul.mubr.msk.f32.gmra.mrb[30].mxu0 %vm279_vm1, %v4300_v61  ;;  %v6945_v61 = vld [vmem:[#allocation30_spill] sm:$0xff] }
  0xbd   : > { %4898 = vmatprep.mubr.msk.f32.mxu1 %vm279_vm1, %v6024_v52  ;;  %5124 = vmatprep.mubr.msk.f32.mxu0 %vm279_vm1, %v5772_v8  ;;  %v6927_v8 = vld [vmem:[#allocation34_spill] sm:$0xff] }
  0xc0   : > { %4899 = vmatmul.mubr.msk.f32.gmra.mrb[16].mxu1 %vm279_vm1, %v6038_v54  ;;  %5125 = vmatmul.mubr.msk.f32.vlgmr.msra.gmra.mrb[0].mxu0 %vm279_vm1, %v5787_v11  ;;  %v6928_v11 = vld [vmem:[#allocation9_spill] sm:$0xff] }
  0xc1   : > { %5173 = vmatpush3.msk.msra.mxu0 %vm376_vm0, %v6223_v37  ;;  %4901 = vmatprep.mubr.msk.f32.mxu1 %vm279_vm1, %v6042_v56  ;;  %v6942_v37 = vld [vmem:[#allocation16_spill] sm:$0xff] }
  0xc2   : > { %5127 = vmatprep.mubr.msk.f32.mxu0 %vm279_vm1, %v5793_v12  ;;  %v6929_v12 = vld [vmem:[#allocation22_spill] sm:$0xff] }
  0xc4   : > { %4902 = vmatmul.mubr.msk.f32.gmra.mrb[18].mxu1 %vm279_vm1, %v6053_v58  ;;  %5128 = vmatmul.mubr.msk.f32.gmra.mrb[2].mxu0 %vm279_vm1, %v5806_v13  ;;  %v6930_v13 = vld [vmem:[#allocation10_spill] sm:$0xff] }
  0xc5   : > { %4904 = vmatprep.mubr.msk.f32.mxu1 %vm279_vm1, %v6059_v60  ;;  %5130 = vmatprep.mubr.msk.f32.mxu0 %vm279_vm1, %v5809_v14  ;;  %v6931_v14 = vld [vmem:[#allocation23_spill] sm:$0xff] }
  0xc8   : > { %4905 = vmatmul.mubr.msk.f32.gmra.mrb[20].mxu1 %vm279_vm1, %v6077_v63  ;;  %5131 = vmatmul.mubr.msk.f32.gmra.mrb[4].mxu0 %vm279_vm1, %v5820_v15  ;;  %v6932_v15 = vld [vmem:[#allocation11_spill] sm:$0xff] }
  0xc9   : > { %4907 = vmatprep.mubr.msk.f32.mxu1 %vm279_vm1, %v6085_v2  ;;  %5133 = vmatprep.mubr.msk.f32.mxu0 %vm279_vm1, %v5823_v16  ;;  %v6933_v16 = vld [vmem:[#allocation24_spill] sm:$0xff] }
  0xcc   : > { %4908 = vmatmul.mubr.msk.f32.gmra.mrb[22].mxu1 %vm279_vm1, %v6101_v4  ;;  %5134 = vmatmul.mubr.msk.f32.gmra.mrb[6].mxu0 %vm279_vm1, %v5834_v17  ;;  %v6934_v17 = vld [vmem:[#allocation12_spill] sm:$0xff] }
  0xcd   : > { %4910 = vmatprep.mubr.msk.f32.mxu1 %vm279_vm1, %v6107_v6  ;;  %5136 = vmatprep.mubr.msk.f32.mxu0 %vm279_vm1, %v5837_v18  ;;  %v6935_v18 = vld [vmem:[#allocation25_spill] sm:$0xff] }
  0xd0   : > { %4911 = vmatmul.mubr.msk.f32.gmra.mrb[24].mxu1 %vm279_vm1, %v6121_v9  ;;  %5137 = vmatmul.mubr.msk.f32.gmra.mrb[8].mxu0 %vm279_vm1, %v5848_v19  ;;  %v6936_v19 = vld [vmem:[#allocation13_spill] sm:$0xff] }
  0xd1   : > { %4913 = vmatprep.mubr.msk.f32.mxu1 %vm279_vm1, %v6127_v55  ;;  %5139 = vmatprep.mubr.msk.f32.mxu0 %vm279_vm1, %v5851_v20  ;;  %v6937_v20 = vld [vmem:[#allocation26_spill] sm:$0xff] }
  0xd4   : > { %4914 = vmatmul.mubr.msk.f32.gmra.mrb[26].mxu1 %vm279_vm1, %v6141_v53  ;;  %5140 = vmatmul.mubr.msk.f32.gmra.mrb[10].mxu0 %vm279_vm1, %v5862_v21  ;;  %v6938_v21 = vld [vmem:[#allocation14_spill] sm:$0xff] }
  0xd5   : > { %4916 = vmatprep.mubr.msk.f32.mxu1 %vm279_vm1, %v6147_v49  ;;  %5142 = vmatprep.mubr.msk.f32.mxu0 %vm279_vm1, %v5865_v22  ;;  %v6940_v22 = vld [vmem:[#allocation15_spill] sm:$0xff] }
  0xd8   : > { %4917 = vmatmul.mubr.msk.f32.gmra.mrb[28].mxu1 %vm279_vm1, %v6161_v45  ;;  %5143 = vmatmul.mubr.msk.f32.gmra.mrb[12].mxu0 %vm279_vm1, %v5876_v23  ;;  %v6941_v23 = vld [vmem:[#allocation28_spill] sm:$0xff] }
  0xd9   : > { %4919 = vmatprep.mubr.msk.f32.mxu1 %vm279_vm1, %v6167_v41  ;;  %5145 = vmatprep.mubr.msk.f32.mxu0 %vm279_vm1, %v5893_v26 }
  0xdc   : > { %4920 = vmatmul.mubr.msk.f32.gmra.mrb[30].mxu1 %vm279_vm1, %v6927_v8  ;;  %5146 = vmatmul.mubr.msk.f32.gmra.mrb[14].mxu0 %vm279_vm1, %v6928_v11  ;;  %v6954_v8 = vld [vmem:[#allocation37_spill] sm:$0xff] }
  0xdd   : > { %4924 = vmatprep.mubr.msk.f32.mxu1 %vm279_vm1, %v6929_v12  ;;  %5148 = vmatprep.mubr.msk.f32.mxu0 %vm279_vm1, %v6930_v13  ;;  %v6946_v12 = vld [vmem:[#allocation18_spill] sm:$0xff] }
  0xe0   : > { %4925 = vmatmul.mubr.msk.f32.vlgmr.msra.gmra.mrb[0].mxu1 %vm279_vm1, %v6931_v14  ;;  %5149 = vmatmul.mubr.msk.f32.gmra.mrb[16].mxu0 %vm279_vm1, %v6932_v15  ;;  %v6947_v14 = vld [vmem:[#allocation31_spill] sm:$0xff] }
  0xe1   : > { %5223 = vmatpush3.msk.msra.mxu1 %vm376_vm0, %v5742_v1  ;;  %4927 = vmatprep.mubr.msk.f32.mxu1 %vm279_vm1, %v6933_v16  ;;  %v6939_v1 = vld [vmem:[#allocation27_spill] sm:$0xff] }
  0xe2   : > { %5151 = vmatprep.mubr.msk.f32.mxu0 %vm279_vm1, %v6934_v17  ;;  %v6948_v16 = vld [vmem:[#allocation19_spill] sm:$0xff] }
  0xe4   : > { %4928 = vmatmul.mubr.msk.f32.gmra.mrb[2].mxu1 %vm279_vm1, %v6935_v18  ;;  %5152 = vmatmul.mubr.msk.f32.gmra.mrb[18].mxu0 %vm279_vm1, %v6936_v19  ;;  %v6949_v18 = vld [vmem:[#allocation32_spill] sm:$0xff] }
  0xe5   : > { %4930 = vmatprep.mubr.msk.f32.mxu1 %vm279_vm1, %v6937_v20  ;;  %5154 = vmatprep.mubr.msk.f32.mxu0 %vm279_vm1, %v6938_v21  ;;  %v6950_v20 = vld [vmem:[#allocation20_spill] sm:$0xff] }
  0xe8   : > { %4931 = vmatmul.mubr.msk.f32.gmra.mrb[4].mxu1 %vm279_vm1, %v6939_v1  ;;  %5155 = vmatmul.mubr.msk.f32.gmra.mrb[20].mxu0 %vm279_vm1, %v6940_v22  ;;  %v6515_v1 = vld [vmem:[%s5763_s13 + $0x181] sm:$0xff] }
  0xe9   : > { %4933 = vmatprep.mubr.msk.f32.mxu1 %vm279_vm1, %v6941_v23  ;;  %5157 = vmatprep.mubr.msk.f32.mxu0 %vm279_vm1, %v6942_v37  ;;  %v6951_v23 = vld [vmem:[#allocation33_spill] sm:$0xff] }
  0xec   : > { %4934 = vmatmul.mubr.msk.f32.gmra.mrb[6].mxu1 %vm279_vm1, %v6943_v3  ;;  %5158 = vmatmul.mubr.msk.f32.gmra.mrb[22].mxu0 %vm279_vm1, %v6944_v33  ;;  %v6952_v3 = vld [vmem:[#allocation21_spill] sm:$0xff] }
  0xed   : > { %4936 = vmatprep.mubr.msk.f32.mxu1 %vm279_vm1, %v6945_v61  ;;  %5160 = vmatprep.mubr.msk.f32.mxu0 %vm279_vm1, %v6946_v12  ;;  %v6953_v61 = vld [vmem:[#allocation35_spill] sm:$0xff] }
  0xf0   : > { %4937 = vmatmul.mubr.msk.f32.gmra.mrb[8].mxu1 %vm279_vm1, %v6947_v14  ;;  %5161 = vmatmul.mubr.msk.f32.gmra.mrb[24].mxu0 %vm279_vm1, %v6948_v16  ;;  %v6526_v14 = vld [vmem:[%s5763_s13 + $0x189] sm:$0xff] }
  0xf1   : > { %4939 = vmatprep.mubr.msk.f32.mxu1 %vm279_vm1, %v6949_v18  ;;  %5163 = vmatprep.mubr.msk.f32.mxu0 %vm279_vm1, %v6950_v20  ;;  %v4365_v18 = vld [vmem:[%s5763_s13 + $0x199] sm:$0xff] }
  0xf4   : > { %4940 = vmatmul.mubr.msk.f32.gmra.mrb[10].mxu1 %vm279_vm1, %v6951_v23  ;;  %5164 = vmatmul.mubr.msk.f32.gmra.mrb[26].mxu0 %vm279_vm1, %v6952_v3  ;;  %v4366_v23 = vld [vmem:[%s5763_s13 + $0x1a1] sm:$0xff]  ;;  %v6955_v3 = vld [vmem:[#allocation39_spill] sm:$0xff] }
  0xf5   : > { %4942 = vmatprep.mubr.msk.f32.mxu1 %vm279_vm1, %v6953_v61  ;;  %5166 = vmatprep.mubr.msk.f32.mxu0 %vm279_vm1, %v6515_v1 }
  0xf8   : > { %4943 = vmatmul.mubr.msk.f32.gmra.mrb[12].mxu1 %vm279_vm1, %v6954_v8  ;;  %5167 = vmatmul.mubr.msk.f32.gmra.mrb[28].mxu0 %vm279_vm1, %v6526_v14 }
  0xf9   : > { %4945 = vmatprep.mubr.msk.f32.mxu1 %vm279_vm1, %v6204_v59  ;;  %5169 = vmatprep.mubr.msk.f32.mxu0 %vm279_vm1, %v4365_v18 }
  0xfc   : > { %4946 = vmatmul.mubr.msk.f32.gmra.mrb[14].mxu1 %vm279_vm1, %v6955_v3  ;;  %5170 = vmatmul.mubr.msk.f32.gmra.mrb[30].mxu0 %vm279_vm1, %v4366_v23 }
  0xfd   : > { %4948 = vmatprep.mubr.msk.f32.mxu1 %vm279_vm1, %v6218_v29  ;;  %5174 = vmatprep.mubr.msk.f32.mxu0 %vm279_vm1, %v5896_v27  ;;  %v6957_v27 = vld [vmem:[#allocation36_spill] sm:$0xff] }
  0xfe   : > { %v4431_v29 = vld [vmem:[%s5763_s13 + $0x19a] sm:$0xff] }
 0x100   : > { %4949 = vmatmul.mubr.msk.f32.gmra.mrb[16].mxu1 %vm279_vm1, %v6234_v31  ;;  %5175 = vmatmul.mubr.msk.f32.vlgmr.msra.gmra.mrb[0].mxu0 %vm279_vm1, %v5914_v30  ;;  %v6958_v30 = vld [vmem:[#allocation21_spill] sm:$0xff]  ;;  %v6959_v31 = vld [vmem:[#allocation38_spill] sm:$0xff] }
 0x101   : > { %4951 = vmatprep.mubr.msk.f32.mxu1 %vm279_vm1, %v6239_v0  ;;  %5177 = vmatprep.mubr.msk.f32.mxu0 %vm279_vm1, %v5922_v32  ;;  %v4432_v32 = vld [vmem:[%s5763_s13 + $0x1a2] sm:$0xff] }
 0x104   : > { %4952 = vmatmul.mubr.msk.f32.gmra.mrb[18].mxu1 %vm279_vm1, %v6252_v28  ;;  %5178 = vmatmul.mubr.msk.f32.gmra.mrb[2].mxu0 %vm279_vm1, %v5938_v34 }
 0x105   : > { %4954 = vmatprep.mubr.msk.f32.mxu1 %vm279_vm1, %v6255_v5  ;;  %5180 = vmatprep.mubr.msk.f32.mxu0 %vm279_vm1, %v5944_v36 }
 0x108   : > { %4955 = vmatmul.mubr.msk.f32.gmra.mrb[20].mxu1 %vm279_vm1, %v6266_v7  ;;  %5181 = vmatmul.mubr.msk.f32.gmra.mrb[4].mxu0 %vm279_vm1, %v5958_v38 }
 0x109   : > { %4957 = vmatprep.mubr.msk.f32.mxu1 %vm279_vm1, %v6269_v10  ;;  %5183 = vmatprep.mubr.msk.f32.mxu0 %vm279_vm1, %v5964_v40 }
 0x10c   : > { %4958 = vmatmul.mubr.msk.f32.gmra.mrb[22].mxu1 %vm279_vm1, %v6280_v57  ;;  %5184 = vmatmul.mubr.msk.f32.gmra.mrb[6].mxu0 %vm279_vm1, %v5978_v42 }
 0x10d   : > { %4960 = vmatprep.mubr.msk.f32.mxu1 %vm279_vm1, %v6283_v51  ;;  %5186 = vmatprep.mubr.msk.f32.mxu0 %vm279_vm1, %v5984_v44 }
 0x110   : > { %4961 = vmatmul.mubr.msk.f32.gmra.mrb[24].mxu1 %vm279_vm1, %v6294_v47  ;;  %5187 = vmatmul.mubr.msk.f32.gmra.mrb[8].mxu0 %vm279_vm1, %v5998_v46 }
 0x111   : > { %4963 = vmatprep.mubr.msk.f32.mxu1 %vm279_vm1, %v6297_v43  ;;  %5189 = vmatprep.mubr.msk.f32.mxu0 %vm279_vm1, %v6004_v48 }
 0x114   : > { %4964 = vmatmul.mubr.msk.f32.gmra.mrb[26].mxu1 %vm279_vm1, %v6308_v39  ;;  %5190 = vmatmul.mubr.msk.f32.gmra.mrb[10].mxu0 %vm279_vm1, %v6018_v50 }
 0x115   : > { %4966 = vmatprep.mubr.msk.f32.mxu1 %vm279_vm1, %v6311_v35  ;;  %5192 = vmatprep.mubr.msk.f32.mxu0 %vm279_vm1, %v6024_v52 }
 0x118   : > { %4967 = vmatmul.mubr.msk.f32.gmra.mrb[28].mxu1 %vm279_vm1, %v6322_v62  ;;  %5193 = vmatmul.mubr.msk.f32.gmra.mrb[12].mxu0 %vm279_vm1, %v6038_v54 }
 0x119   : > { %4969 = vmatprep.mubr.msk.f32.mxu1 %vm279_vm1, %v6377_v24  ;;  %5195 = vmatprep.mubr.msk.f32.mxu0 %vm279_vm1, %v6042_v56 }
 0x11c   : > { %4970 = vmatmul.mubr.msk.f32.gmra.mrb[30].mxu1 %vm279_vm1, %v6388_v25  ;;  %5196 = vmatmul.mubr.msk.f32.gmra.mrb[14].mxu0 %vm279_vm1, %v6053_v58 }
 0x11d   : > { %4998 = vmatprep.mubr.msk.f32.mxu1 %vm279_vm1, %v5893_v26  ;;  %5198 = vmatprep.mubr.msk.f32.mxu0 %vm279_vm1, %v6059_v60  ;;  %v6956_v26 = vld [vmem:[#allocation34_spill] sm:$0xff] }
 0x120   : > { %4999 = vmatmul.mubr.msk.f32.vlgmr.msra.gmra.mrb[16].mxu1 %vm279_vm1, %v6928_v11  ;;  %5199 = vmatmul.mubr.msk.f32.gmra.mrb[16].mxu0 %vm279_vm1, %v6077_v63 }
 0x121   : > { %5001 = vmatprep.mubr.msk.f32.mxu1 %vm279_vm1, %v6930_v13  ;;  %5201 = vmatprep.mubr.msk.f32.mxu0 %vm279_vm1, %v6085_v2 }
 0x124   : > { %5002 = vmatmul.mubr.msk.f32.gmra.mrb[18].mxu1 %vm279_vm1, %v6932_v15  ;;  %5202 = vmatmul.mubr.msk.f32.gmra.mrb[18].mxu0 %vm279_vm1, %v6101_v4 }
 0x125   : > { %5004 = vmatprep.mubr.msk.f32.mxu1 %vm279_vm1, %v6934_v17  ;;  %5204 = vmatprep.mubr.msk.f32.mxu0 %vm279_vm1, %v6107_v6 }
 0x128   : > { %5005 = vmatmul.mubr.msk.f32.gmra.mrb[20].mxu1 %vm279_vm1, %v6936_v19  ;;  %5205 = vmatmul.mubr.msk.f32.gmra.mrb[20].mxu0 %vm279_vm1, %v6121_v9 }
 0x129   : > { %5007 = vmatprep.mubr.msk.f32.mxu1 %vm279_vm1, %v6938_v21  ;;  %5207 = vmatprep.mubr.msk.f32.mxu0 %vm279_vm1, %v6127_v55 }
 0x12c   : > { %5008 = vmatmul.mubr.msk.f32.gmra.mrb[22].mxu1 %vm279_vm1, %v6940_v22  ;;  %5208 = vmatmul.mubr.msk.f32.gmra.mrb[22].mxu0 %vm279_vm1, %v6141_v53 }
 0x12d   : > { %5010 = vmatprep.mubr.msk.f32.mxu1 %vm279_vm1, %v6942_v37  ;;  %5210 = vmatprep.mubr.msk.f32.mxu0 %vm279_vm1, %v6147_v49 }
 0x130   : > { %5011 = vmatmul.mubr.msk.f32.gmra.mrb[24].mxu1 %vm279_vm1, %v6944_v33  ;;  %5211 = vmatmul.mubr.msk.f32.gmra.mrb[24].mxu0 %vm279_vm1, %v6161_v45 }
 0x131   : > { %5013 = vmatprep.mubr.msk.f32.mxu1 %vm279_vm1, %v6946_v12  ;;  %5213 = vmatprep.mubr.msk.f32.mxu0 %vm279_vm1, %v6167_v41 }
 0x134   : > { %5014 = vmatmul.mubr.msk.f32.gmra.mrb[26].mxu1 %vm279_vm1, %v6948_v16  ;;  %5214 = vmatmul.mubr.msk.f32.gmra.mrb[26].mxu0 %vm279_vm1, %v6956_v26 }
 0x135   : > { %5016 = vmatprep.mubr.msk.f32.mxu1 %vm279_vm1, %v6950_v20  ;;  %5216 = vmatprep.mubr.msk.f32.mxu0 %vm279_vm1, %v6957_v27 }
 0x138   : > { %5017 = vmatmul.mubr.msk.f32.gmra.mrb[28].mxu1 %vm279_vm1, %v6958_v30  ;;  %5217 = vmatmul.mubr.msk.f32.gmra.mrb[28].mxu0 %vm279_vm1, %v6959_v31 }
 0x139   : > { %5019 = vmatprep.mubr.msk.f32.mxu1 %vm279_vm1, %v6515_v1  ;;  %5219 = vmatprep.mubr.msk.f32.mxu0 %vm279_vm1, %v4431_v29 }
 0x13c   : > { %5020 = vmatmul.mubr.msk.f32.gmra.mrb[30].mxu1 %vm279_vm1, %v6526_v14  ;;  %5220 = vmatmul.mubr.msk.f32.gmra.mrb[30].mxu0 %vm279_vm1, %v4432_v32 }
 0x1b3   : > { %v4926_v34 = vpop.f32.mrb[0].mxu1 }
 0x1b4   : > { %v1519_v35 = vpop.f32.mrb[1].mxu1 }
 0x1b7   : > { %v4929_v36 = vpop.f32.mrb[2].mxu1 }
 0x1b8   : > { %v1529_v38 = vpop.f32.mrb[3].mxu1 }
 0x1bb   : > { %v4932_v39 = vpop.f32.mrb[4].mxu1 }
 0x1bc   : > { %v1539_v40 = vpop.f32.mrb[5].mxu1 }
 0x1bf   : > { %v4935_v41 = vpop.f32.mrb[6].mxu1 }
 0x1c0   : > { %v1549_v42 = vpop.f32.mrb[7].mxu1 }
 0x1c3   : > { %v4938_v43 = vpop.f32.mrb[8].mxu1 }
 0x1c4   : > { %v1559_v44 = vpop.f32.mrb[9].mxu1 }
 0x1c7   : > { %v6668_v45 = vpop.f32.mrb[10].mxu1 }
 0x1c8   : > { %v6670_v46 = vpop.f32.mrb[11].mxu1 }
 0x1cb   : > { %v6672_v47 = vpop.f32.mrb[12].mxu1 }
 0x1cc   : > { %v6674_v48 = vpop.f32.mrb[13].mxu1 }
 0x1cf   : > { %v6679_v49 = vpop.f32.mrb[14].mxu1 }
 0x1d0   : > { %v6681_v50 = vpop.f32.mrb[15].mxu1 }
 0x1d3   : > { %v5176_v51 = vpop.f32.mrb[0].mxu0 }
 0x1d4   : > { %v5224_v52 = vadd.f32 %v5176_v51, %v4926_v34  ;;  %v3470_v53 = vpop.f32.mrb[1].mxu0 }
 0x1d5   : > { %v5225_v54 = vadd.f32 %v3470_v53, %v1519_v35 }
 0x1d6   : > { %3662 = vst [vmem:[%s6684_s10 + $0x8] sm:$0xff] %v5224_v52  ;;  %v3732_v56 = vmul.f32 %v5224_v52, %v5224_v52 }
 0x1d7   : > { %3661 = vst [vmem:[%s6684_s10] sm:$0xff] %v5225_v54  ;;  %v3693_v58 = vadd.f32 %v5225_v54, %v5224_v52  ;;  %v3731_v59 = vmul.f32 %v5225_v54, %v5225_v54  ;;  %v5179_v60 = vpop.f32.mrb[2].mxu0 }
 0x1d8   : > { %v5226_v62 = vadd.f32 %v5179_v60, %v4929_v36  ;;  %v3480_v63 = vpop.f32.mrb[3].mxu0 }
 0x1d9   : > { %v3763_v0 = vadd.f32 %v3732_v56, %v3731_v59  ;;  %v5227_v2 = vadd.f32 %v3480_v63, %v1529_v38 }
 0x1da   : > { %3664 = vst [vmem:[%s6684_s10 + $0x18] sm:$0xff] %v5226_v62  ;;  %v3734_v10 = vmul.f32 %v5226_v62, %v5226_v62 }
 0x1db   : > { %3663 = vst [vmem:[%s6684_s10 + $0x10] sm:$0xff] %v5227_v2  ;;  %v3694_v4 = vadd.f32 %v5227_v2, %v3693_v58  ;;  %v3733_v5 = vmul.f32 %v5227_v2, %v5227_v2  ;;  %v5182_v6 = vpop.f32.mrb[4].mxu0 }
 0x1dc   : > { %v5228_v7 = vadd.f32 %v5182_v6, %v4932_v39  ;;  %v3490_v9 = vpop.f32.mrb[5].mxu0 }
 0x1dd   : > { %v3764_v55 = vadd.f32 %v3763_v0, %v3733_v5  ;;  %v5229_v57 = vadd.f32 %v3490_v9, %v1539_v40  ;;  %v3695_v28 = vadd.f32 %v5226_v62, %v3694_v4 }
 0x1de   : > { %3666 = vst [vmem:[%s6684_s10 + $0x28] sm:$0xff] %v5228_v7  ;;  %v3736_v17 = vmul.f32 %v5228_v7, %v5228_v7 }
 0x1df   : > { %3665 = vst [vmem:[%s6684_s10 + $0x20] sm:$0xff] %v5229_v57  ;;  %v3696_v24 = vadd.f32 %v5229_v57, %v3695_v28  ;;  %v3735_v25 = vmul.f32 %v5229_v57, %v5229_v57  ;;  %v3765_v8 = vadd.f32 %v3764_v55, %v3734_v10  ;;  %v5185_v11 = vpop.f32.mrb[6].mxu0 }
 0x1e0   : > { %v5230_v13 = vadd.f32 %v5185_v11, %v4935_v41  ;;  %v3500_v15 = vpop.f32.mrb[7].mxu0 }
 0x1e1   : > { %v3766_v19 = vadd.f32 %v3765_v8, %v3735_v25  ;;  %v5231_v21 = vadd.f32 %v3500_v15, %v1549_v42  ;;  %v3697_v22 = vadd.f32 %v5228_v7, %v3696_v24 }
 0x1e2   : > { %3668 = vst [vmem:[%s6684_s10 + $0x38] sm:$0xff] %v5230_v13  ;;  %v3738_v3 = vmul.f32 %v5230_v13, %v5230_v13 }
 0x1e3   : > { %3667 = vst [vmem:[%s6684_s10 + $0x30] sm:$0xff] %v5231_v21  ;;  %v3698_v37 = vadd.f32 %v5231_v21, %v3697_v22  ;;  %v3737_v33 = vmul.f32 %v5231_v21, %v5231_v21  ;;  %v3767_v12 = vadd.f32 %v3766_v19, %v3736_v17  ;;  %v5188_v16 = vpop.f32.mrb[8].mxu0 }
 0x1e4   : > { %v5232_v20 = vadd.f32 %v5188_v16, %v4938_v43  ;;  %v3510_v1 = vpop.f32.mrb[9].mxu0 }
 0x1e5   : > { %v3768_v61 = vadd.f32 %v3767_v12, %v3737_v33  ;;  %v5233_v14 = vadd.f32 %v3510_v1, %v1559_v44  ;;  %v3699_v18 = vadd.f32 %v5230_v13, %v3698_v37 }
 0x1e6   : > { %3670 = vst [vmem:[%s6684_s10 + $0x48] sm:$0xff] %v5232_v20  ;;  %v3740_v32 = vmul.f32 %v5232_v20, %v5232_v20 }
 0x1e7   : > { %3669 = vst [vmem:[%s6684_s10 + $0x40] sm:$0xff] %v5233_v14  ;;  %v3700_v23 = vadd.f32 %v5233_v14, %v3699_v18  ;;  %v3739_v26 = vmul.f32 %v5233_v14, %v5233_v14  ;;  %v3769_v27 = vadd.f32 %v3768_v61, %v3738_v3  ;;  %v5191_v29 = vpop.f32.mrb[10].mxu0 }
 0x1e8   : > { %v5234_v30 = vadd.f32 %v5191_v29, %v6668_v45  ;;  %v3520_v31 = vpop.f32.mrb[11].mxu0 }
 0x1e9   : > { %v3770_v34 = vadd.f32 %v3769_v27, %v3739_v26  ;;  %v5235_v35 = vadd.f32 %v3520_v31, %v6670_v46  ;;  %v3701_v36 = vadd.f32 %v5232_v20, %v3700_v23 }
 0x1ea   : > { %3672 = vst [vmem:[%s6684_s10 + $0x58] sm:$0xff] %v5234_v30  ;;  %v3742_v44 = vmul.f32 %v5234_v30, %v5234_v30 }
 0x1eb   : > { %3671 = vst [vmem:[%s6684_s10 + $0x50] sm:$0xff] %v5235_v35  ;;  %v3702_v38 = vadd.f32 %v5235_v35, %v3701_v36  ;;  %v3741_v39 = vmul.f32 %v5235_v35, %v5235_v35  ;;  %v3771_v40 = vadd.f32 %v3770_v34, %v3740_v32  ;;  %v5194_v41 = vpop.f32.mrb[12].mxu0 }
 0x1ec   : > { %v5236_v42 = vadd.f32 %v5194_v41, %v6672_v47  ;;  %v3530_v43 = vpop.f32.mrb[13].mxu0 }
 0x1ed   : > { %v3772_v45 = vadd.f32 %v3771_v40, %v3741_v39  ;;  %v5237_v51 = vadd.f32 %v3530_v43, %v6674_v48  ;;  %v3703_v52 = vadd.f32 %v5234_v30, %v3702_v38 }
 0x1ee   : > { %3674 = vst [vmem:[%s6684_s10 + $0x68] sm:$0xff] %v5236_v42  ;;  %v3744_v60 = vmul.f32 %v5236_v42, %v5236_v42 }
 0x1ef   : > { %3673 = vst [vmem:[%s6684_s10 + $0x60] sm:$0xff] %v5237_v51  ;;  %v3704_v46 = vadd.f32 %v5237_v51, %v3703_v52  ;;  %v3743_v53 = vmul.f32 %v5237_v51, %v5237_v51  ;;  %v3773_v54 = vadd.f32 %v3772_v45, %v3742_v44  ;;  %v5197_v56 = vpop.f32.mrb[14].mxu0 }
 0x1f0   : > { %v5238_v58 = vadd.f32 %v5197_v56, %v6679_v49  ;;  %v3540_v59 = vpop.f32.mrb[15].mxu0 }
 0x1f1   : > { %v3774_v62 = vadd.f32 %v3773_v54, %v3743_v53  ;;  %v5239_v47 = vadd.f32 %v3540_v59, %v6681_v50  ;;  %v3705_v63 = vadd.f32 %v5236_v42, %v3704_v46 }
 0x1f2   : > { %3676 = vst [vmem:[%s6684_s10 + $0x78] sm:$0xff] %v5238_v58  ;;  %v3746_v10 = vmul.f32 %v5238_v58, %v5238_v58 }
 0x1f3   : > { %3675 = vst [vmem:[%s6684_s10 + $0x70] sm:$0xff] %v5239_v47  ;;  %v3706_v48 = vadd.f32 %v5239_v47, %v3705_v63  ;;  %v3745_v0 = vmul.f32 %v5239_v47, %v5239_v47  ;;  %v3775_v2 = vadd.f32 %v3774_v62, %v3744_v60  ;;  %v5000_v4 = vpop.f32.mrb[16].mxu1  ;;  %v5200_v5 = vpop.f32.mrb[16].mxu0 }
 0x1f4   : > { %v5240_v6 = vadd.f32 %v5200_v5, %v5000_v4  ;;  %v1989_v7 = vpop.f32.mrb[17].mxu1  ;;  %v3550_v9 = vpop.f32.mrb[17].mxu0 }
 0x1f5   : > { %v3776_v49 = vadd.f32 %v3775_v2, %v3745_v0  ;;  %v5241_v55 = vadd.f32 %v3550_v9, %v1989_v7  ;;  %v3707_v57 = vadd.f32 %v5238_v58, %v3706_v48 }
 0x1f6   : > { %3678 = vst [vmem:[%s6684_s10 + $0x88] sm:$0xff] %v5240_v6  ;;  %v3748_v17 = vmul.f32 %v5240_v6, %v5240_v6 }
 0x1f7   : > { %3677 = vst [vmem:[%s6684_s10 + $0x80] sm:$0xff] %v5241_v55  ;;  %v3708_v50 = vadd.f32 %v5241_v55, %v3707_v57  ;;  %v3747_v28 = vmul.f32 %v5241_v55, %v5241_v55  ;;  %v3777_v24 = vadd.f32 %v3776_v49, %v3746_v10  ;;  %v5003_v25 = vpop.f32.mrb[18].mxu1  ;;  %v5203_v8 = vpop.f32.mrb[18].mxu0 }
 0x1f8   : > { %v5242_v11 = vadd.f32 %v5203_v8, %v5003_v25  ;;  %v1999_v13 = vpop.f32.mrb[19].mxu1  ;;  %v3560_v15 = vpop.f32.mrb[19].mxu0 }
 0x1f9   : > { %v3778_v19 = vadd.f32 %v3777_v24, %v3747_v28  ;;  %v5243_v21 = vadd.f32 %v3560_v15, %v1999_v13  ;;  %v3709_v22 = vadd.f32 %v5240_v6, %v3708_v50 }
 0x1fa   : > { %3680 = vst [vmem:[%s6684_s10 + $0x98] sm:$0xff] %v5242_v11  ;;  %v3750_v14 = vmul.f32 %v5242_v11, %v5242_v11 }
 0x1fb   : > { %3679 = vst [vmem:[%s6684_s10 + $0x90] sm:$0xff] %v5243_v21  ;;  %v3710_v37 = vadd.f32 %v5243_v21, %v3709_v22  ;;  %v3749_v33 = vmul.f32 %v5243_v21, %v5243_v21  ;;  %v3779_v12 = vadd.f32 %v3778_v19, %v3748_v17  ;;  %v5006_v16 = vpop.f32.mrb[20].mxu1  ;;  %v5206_v20 = vpop.f32.mrb[20].mxu0 }
 0x1fc   : > { %v5244_v1 = vadd.f32 %v5206_v20, %v5006_v16  ;;  %v2009_v3 = vpop.f32.mrb[21].mxu1  ;;  %v3570_v61 = vpop.f32.mrb[21].mxu0 }
 0x1fd   : > { %v3780_v18 = vadd.f32 %v3779_v12, %v3749_v33  ;;  %v5245_v23 = vadd.f32 %v3570_v61, %v2009_v3  ;;  %v3711_v26 = vadd.f32 %v5242_v11, %v3710_v37 }
 0x1fe   : > { %3682 = vst [vmem:[%s6684_s10 + $0xa8] sm:$0xff] %v5244_v1  ;;  %v3752_v38 = vmul.f32 %v5244_v1, %v5244_v1 }
 0x1ff   : > { %3681 = vst [vmem:[%s6684_s10 + $0xa0] sm:$0xff] %v5245_v23  ;;  %v3712_v27 = vadd.f32 %v5245_v23, %v3711_v26  ;;  %v3751_v29 = vmul.f32 %v5245_v23, %v5245_v23  ;;  %v3781_v30 = vadd.f32 %v3780_v18, %v3750_v14  ;;  %v5009_v31 = vpop.f32.mrb[22].mxu1  ;;  %v5209_v32 = vpop.f32.mrb[22].mxu0 }
 0x200   : > { %v5246_v34 = vadd.f32 %v5209_v32, %v5009_v31  ;;  %v2019_v35 = vpop.f32.mrb[23].mxu1  ;;  %v3580_v36 = vpop.f32.mrb[23].mxu0 }
 0x201   : > { %v3782_v39 = vadd.f32 %v3781_v30, %v3751_v29  ;;  %v5247_v40 = vadd.f32 %v3580_v36, %v2019_v35  ;;  %v3713_v41 = vadd.f32 %v5244_v1, %v3712_v27 }
 0x202   : > { %3684 = vst [vmem:[%s6684_s10 + $0xb8] sm:$0xff] %v5246_v34  ;;  %v3754_v54 = vmul.f32 %v5246_v34, %v5246_v34 }
 0x203   : > { %3683 = vst [vmem:[%s6684_s10 + $0xb0] sm:$0xff] %v5247_v40  ;;  %v3714_v42 = vadd.f32 %v5247_v40, %v3713_v41  ;;  %v3753_v43 = vmul.f32 %v5247_v40, %v5247_v40  ;;  %v3783_v44 = vadd.f32 %v3782_v39, %v3752_v38  ;;  %v5012_v45 = vpop.f32.mrb[24].mxu1  ;;  %v5212_v51 = vpop.f32.mrb[24].mxu0 }
 0x204   : > { %v5248_v52 = vadd.f32 %v5212_v51, %v5012_v45  ;;  %v2029_v46 = vpop.f32.mrb[25].mxu1  ;;  %v3590_v53 = vpop.f32.mrb[25].mxu0 }
 0x205   : > { %v3784_v56 = vadd.f32 %v3783_v44, %v3753_v43  ;;  %v5249_v58 = vadd.f32 %v3590_v53, %v2029_v46  ;;  %v3715_v59 = vadd.f32 %v5246_v34, %v3714_v42 }
 0x206   : > { %3686 = vst [vmem:[%s6684_s10 + $0xc8] sm:$0xff] %v5248_v52  ;;  %v3756_v5 = vmul.f32 %v5248_v52, %v5248_v52 }
 0x207   : > { %3685 = vst [vmem:[%s6684_s10 + $0xc0] sm:$0xff] %v5249_v58  ;;  %v3716_v60 = vadd.f32 %v5249_v58, %v3715_v59  ;;  %v3755_v62 = vmul.f32 %v5249_v58, %v5249_v58  ;;  %v3785_v47 = vadd.f32 %v3784_v56, %v3754_v54  ;;  %v5015_v63 = vpop.f32.mrb[26].mxu1  ;;  %v5215_v48 = vpop.f32.mrb[26].mxu0 }
 0x208   : > { %v5250_v0 = vadd.f32 %v5215_v48, %v5015_v63  ;;  %v2039_v2 = vpop.f32.mrb[27].mxu1  ;;  %v3600_v4 = vpop.f32.mrb[27].mxu0 }
 0x209   : > { %v3786_v6 = vadd.f32 %v3785_v47, %v3755_v62  ;;  %v5251_v7 = vadd.f32 %v3600_v4, %v2039_v2  ;;  %v3717_v9 = vadd.f32 %v5248_v52, %v3716_v60 }
 0x20a   : > { %3688 = vst [vmem:[%s6684_s10 + $0xd8] sm:$0xff] %v5250_v0  ;;  %v3758_v8 = vmul.f32 %v5250_v0, %v5250_v0 }
 0x20b   : > { %3687 = vst [vmem:[%s6684_s10 + $0xd0] sm:$0xff] %v5251_v7  ;;  %v3718_v10 = vadd.f32 %v5251_v7, %v3717_v9  ;;  %v3757_v49 = vmul.f32 %v5251_v7, %v5251_v7  ;;  %v3787_v55 = vadd.f32 %v3786_v6, %v3756_v5  ;;  %v5018_v57 = vpop.f32.mrb[28].mxu1  ;;  %v5218_v50 = vpop.f32.mrb[28].mxu0 }
 0x20c   : > { %v5252_v28 = vadd.f32 %v5218_v50, %v5018_v57  ;;  %v2049_v24 = vpop.f32.mrb[29].mxu1  ;;  %v3610_v25 = vpop.f32.mrb[29].mxu0 }
 0x20d   : > { %v3788_v11 = vadd.f32 %v3787_v55, %v3757_v49  ;;  %v5253_v13 = vadd.f32 %v3610_v25, %v2049_v24  ;;  %v3719_v15 = vadd.f32 %v5250_v0, %v3718_v10 }
 0x20e   : > { %3690 = vst [vmem:[%s6684_s10 + $0xe8] sm:$0xff] %v5252_v28  ;;  %v3760_v20 = vmul.f32 %v5252_v28, %v5252_v28 }
 0x20f   : > { %3689 = vst [vmem:[%s6684_s10 + $0xe0] sm:$0xff] %v5253_v13  ;;  %v3720_v17 = vadd.f32 %v5253_v13, %v3719_v15  ;;  %v3759_v19 = vmul.f32 %v5253_v13, %v5253_v13  ;;  %v3789_v21 = vadd.f32 %v3788_v11, %v3758_v8  ;;  %v5021_v22 = vpop.f32.mrb[30].mxu1  ;;  %v5221_v37 = vpop.f32.mrb[30].mxu0 }
 0x210   : > { %v5254_v33 = vadd.f32 %v5221_v37, %v5021_v22  ;;  %v2059_v12 = vpop.f32.mrb[31].mxu1  ;;  %v3620_v16 = vpop.f32.mrb[31].mxu0 }
 0x211   : > { %v3790_v1 = vadd.f32 %v3789_v21, %v3759_v19  ;;  %v5255_v3 = vadd.f32 %v3620_v16, %v2059_v12  ;;  %v3721_v61 = vadd.f32 %v5252_v28, %v3720_v17 }
 0x212   : > { %3692 = vst [vmem:[%s6684_s10 + $0xf8] sm:$0xff] %v5254_v33 }
 0x213   : > { %3691 = vst [vmem:[%s6684_s10 + $0xf0] sm:$0xff] %v5255_v3  ;;  %v3722_v14 = vadd.f32 %v5255_v3, %v3721_v61  ;;  %v3761_v18 = vmul.f32 %v5255_v3, %v5255_v3  ;;  %v3791_v23 = vadd.f32 %v3790_v1, %v3760_v20 }
 0x214   : > { %5545 = shalt.err (!%p5542_p3)
}
 0x215   : > { %s5546_s5 = scalar_lea.hbm %s6727_s22, 4096  ;;  %s5550_s9 = scalar_lea.hbm %s6846_s2, 8192 }
 0x216   : > { %p5547_p4 = scmp.ne.s32.totalorder %s6727_s22, %s5546_s5  ;;  %p5551_p9 = scmp.lt.u32.totalorder %s6727_s22, %s6846_s2 }
 0x217   : > { %p5552_p10 = scmp.lt.u32.totalorder %s5550_s9, %s5546_s5  ;;  %p5554_p12 = scmp.lt.u32.totalorder %s5546_s5, %s6727_s22 }
 0x218   : > { %p5548_p7 = pnand %p5547_p4, %p5726_p5 }
 0x219   : > { %p5553_p11 = por %p5552_p10, %p5551_p9 }
 0x21a   : > { %p5549_p8 = pneg %p5548_p7 }
 0x21b   : > { %p5555_p13 = por %p5554_p12, %p5553_p11 }
 0x21d   : > { %p5556_p0 = pnand %p5555_p13, %p5549_p8 }
 0x21f   : > { %5559 = shalt.err (!%p5556_p0)
}
 0x220   : > { %s5657_s13 = smov 128   ;;  %s5658_s14 = smov 8   ;;  %v3762_v26 = vmul.f32 %v5254_v33, %v5254_v33  ;;  %v3723_v27 = vadd.f32 %v5254_v33, %v3722_v14  ;;  %v3792_v29 = vadd.f32 %v3791_v23, %v3761_v18 }
 0x221   : > { %5481 = dma.vmem_to_hbm [thread:$0]  (%p5726_p5), %s6729_s12, 4096, %s6727_s22, %s3802_s23, %s5657_s13, %s5657_s13, %s5658_s14  }
 0x222   : > { %v3724_v30 = vrot.slane %v3723_v27, 4  ;;  %v3793_v31 = vadd.f32 %v3792_v29, %v3762_v26  ;;  %s3806_s27 = sand.u32 1, %s5707_s19   ;;  %s4470_s28 = sshll.u32 %s5707_s19, 4 }
 0x223   : > { %s200_s29 = scalar_lea.vmem [#allocation4], %s6677_s8  ;;  %s206_s12 = scalar_lea.vmem [#allocation6], %s6677_s8 }
 0x224   : > { %v3725_v32 = vadd.f32 %v3724_v30, %v3723_v27  ;;  %v3794_v34 = vrot.slane %v3793_v31, 4  ;;  %s3839_s30 = sshll.u32 %s200_s29, 4  ;;  %s3852_s22 = sshll.u32 %s206_s12, 4  ;;  %s6768_s30 = int_to_ptr.vmem [resolvable:$true] %s3839_s30  ;;  %s6775_s22 = int_to_ptr.vmem [resolvable:$true] %s3852_s22 }
 0x225   : > { %s6766_s6 = scalar_lea.hbm %s6847_s3, %s4470_s28  ;;  %s6773_s9 = scalar_lea.hbm %s6848_s4, %s4470_s28 }
 0x226   : > { %v3795_v35 = vadd.f32 %v3794_v34, %v3793_v31  ;;  %v3726_v36 = vrot.slane %v3725_v32, 2  ;;  %s6777_s10 = scalar_lea.sflag [#allocation5], %s3806_s27  ;;  %s5560_s11 = scalar_lea.vmem %s6768_s30, 16 }
 0x227   : > { %p5561_p1 = scmp.ne.s32.totalorder %s6768_s30, %s5560_s11  ;;  %s5659_s13 = smov [#allocation4]  }
 0x228   : > { %v3727_v38 = vadd.f32 %v3726_v36, %v3725_v32  ;;  %v3796_v39 = vrot.slane %v3795_v35, 2  ;;  %s5564_s14 = sshll.u32 %s5659_s13, 4  ;;  %s5565_s14 = int_to_ptr.vmem [resolvable:$false] %s5564_s14 }
 0x229   : > { %p5562_p2 = pnand %p5561_p1, %p5726_p5  ;;  %s5566_s23 = scalar_lea.vmem %s5565_s14, 32 }
 0x22a   : > { %v3728_v40 = vrot.slane %v3727_v38, 1  ;;  %v3797_v41 = vadd.f32 %v3796_v39, %v3795_v35  ;;  %p5567_p4 = scmp.lt.s32.totalorder %s6768_s30, %s5565_s14  ;;  %p5568_p7 = scmp.lt.s32.totalorder %s5566_s23, %s5560_s11 }
 0x22b   : > { %p5563_p3 = pneg %p5562_p2 }
 0x22c   : > { %v3729_v42 = vadd.f32 %v3728_v40, %v3727_v38  ;;  %v3798_v43 = vrot.slane %v3797_v41, 1  ;;  %p5569_p8 = por %p5568_p7, %p5567_p4 }
 0x22e   : > { %3730 = vst [vmem:[%s200_s29] sm:$0x1] %v3729_v42  ;;  %v3799_v44 = vadd.f32 %v3798_v43, %v3797_v41  ;;  %p5570_p9 = pnand %p5569_p8, %p5563_p3 }
 0x230   : > { %5573 = shalt.err (!%p5570_p9)
}
 0x231   : > { %s5574_s27 = scalar_lea.hbm %s6766_s6, 16  ;;  %s5578_s5 = scalar_lea.hbm %s6847_s3, 32 }
 0x232   : > { %p5575_p10 = scmp.ne.s32.totalorder %s6766_s6, %s5574_s27  ;;  %p5579_p13 = scmp.lt.u32.totalorder %s6766_s6, %s6847_s3 }
 0x233   : > { %p5580_p0 = scmp.lt.u32.totalorder %s5578_s5, %s5574_s27  ;;  %p5582_p2 = scmp.lt.u32.totalorder %s5574_s27, %s6766_s6 }
 0x234   : > { %p5576_p11 = pnand %p5575_p10, %p5726_p5 }
 0x235   : > { %p5581_p1 = por %p5580_p0, %p5579_p13 }
 0x236   : > { %p5577_p12 = pneg %p5576_p11 }
 0x237   : > { %p5583_p3 = por %p5582_p2, %p5581_p1 }
 0x239   : > { %p5584_p4 = pnand %p5583_p3, %p5577_p12 }
 0x23b   : > { %5587 = shalt.err (!%p5584_p4)
}
 0x23c   : > { %5482 = dma.vmem_to_hbm [thread:$0]  (%p5726_p5), %s6768_s30, 16, %s6766_s6, %s6777_s10   ;;  %3800 = vst [vmem:[%s206_s12] sm:$0x1] %v3799_v44 }
 0x23d   : > { %s5588_s11 = scalar_lea.vmem %s6775_s22, 16  ;;  %s5660_s13 = smov [#allocation6]  }
 0x23e   : > { %p5589_p7 = scmp.ne.s32.totalorder %s6775_s22, %s5588_s11  ;;  %s5592_s14 = sshll.u32 %s5660_s13, 4  ;;  %s5593_s14 = int_to_ptr.vmem [resolvable:$false] %s5592_s14 }
 0x23f   : > { %s5594_s23 = scalar_lea.vmem %s5593_s14, 32  ;;  %p5595_p10 = scmp.lt.s32.totalorder %s6775_s22, %s5593_s14 }
 0x240   : > { %p5590_p8 = pnand %p5589_p7, %p5726_p5  ;;  %p5596_p11 = scmp.lt.s32.totalorder %s5594_s23, %s5588_s11 }
 0x242   : > { %p5591_p9 = pneg %p5590_p8  ;;  %p5597_p12 = por %p5596_p11, %p5595_p10 }
 0x244   : > { %p5598_p13 = pnand %p5597_p12, %p5591_p9 }
 0x246   : > { %5601 = shalt.err (!%p5598_p13)
}
 0x247   : > { %s5602_s8 = scalar_lea.hbm %s6773_s9, 16  ;;  %s5606_s6 = scalar_lea.hbm %s6848_s4, 32 }
 0x248   : > { %p5603_p0 = scmp.ne.s32.totalorder %s6773_s9, %s5602_s8  ;;  %p5607_p3 = scmp.lt.u32.totalorder %s6773_s9, %s6848_s4 }
 0x249   : > { %p5608_p4 = scmp.lt.u32.totalorder %s5606_s6, %s5602_s8  ;;  %p5610_p8 = scmp.lt.u32.totalorder %s5602_s8, %s6773_s9 }
 0x24a   : > { %p5604_p1 = pnand %p5603_p0, %p5726_p5 }
 0x24b   : > { %p5609_p7 = por %p5608_p4, %p5607_p3 }
 0x24c   : > { %p5605_p2 = pneg %p5604_p1 }
 0x24d   : > { %p5611_p9 = por %p5610_p8, %p5609_p7 }
 0x24f   : > { %p5612_p10 = pnand %p5611_p9, %p5605_p2 }
 0x251   : > { %5615 = shalt.err (!%p5612_p10)
}
 0x252   : > { %5483 = dma.vmem_to_hbm [thread:$0]  (%p5726_p5), %s6775_s22, 16, %s6773_s9, %s6777_s10  }
 0x253 PF: > { %p5497_p11 = scmp.ge.s32.totalorder %s5654_s18, 2  ;;  %s3864_s29 = sand.u32 1, %s5642_s15  }
 0x254   : > { %s3865_s5 = scalar_lea.sflag [#allocation3], %s3864_s29 }
 0x255   : > { %p5488_p12 = pnand %p5497_p11, %p5730_p6 }
 0x257   : > { %5633 = dma.done.wait (!%p5488_p12), %s3865_s5, 4096  }
 0x258   : > { %5635 = vsyncadd (!%p5488_p12), %s3865_s5, 4294963200  ;;  %s3873_s19 = sand.u32 1, %s3964_s20  }
 0x259   : > { %s3874_s7 = scalar_lea.sflag [#allocation5], %s3873_s19 }
 0x25a   : > { %5637 = dma.done.wait (!%p5488_p12), %s3874_s7, 32  }
 0x25b   : > { %5639 = vsyncadd (!%p5488_p12), %s3874_s7, 4294967264  ;;  %p18_p5 = scmp.ge.s32.totalorder %s5711_s21, 4   ;;  %s6960_s15 = smov %s5646_s16 }
 0x25c   : > { %s6961_s16 = smov %s5650_s17  ;;  %s6962_s17 = smov %s5724_s24 }
 0x25d   : > { %s6963_s18 = smov %s5711_s21  ;;  %20 = sbr.rel (!%p18_p5) target bundleno = 5 (0x5), region = 105 }
 0x264   :  { %3886 = vsyncpa [#allocation3], 1 }
 0x265   :  { %3888 = vsyncpa [#allocation3 + $0x1], 1 }
 0x266   :  { %3889 = vsyncpa [#allocation5], 1 }
 0x267   :  { %3891 = vsyncpa [#allocation5 + $0x1], 1 }

</bundles_post_ra>
